<compile_context>
chip_gen: v7x
topology: tpu7x:2x2x1
jax: 0.10.0
libtpu: 0.0.40
codegen_flags: <defaults>
</compile_context>

<pallas_src>
import jax
import jax.numpy as jnp
from jax.experimental import pallas as pl
from jax.experimental.pallas import tpu as pltpu


def _round_up(v, m):
    return ((v + m - 1) // m) * m


def _meta_classifier_kernel(x_ref, wih_ref, whh_ref, b_ref,
                            w1_ref, b1_ref, w2_ref, b2_ref, out_ref, xp_ref):
    T, TB, D = x_ref.shape
    Hp = whh_ref.shape[0]          # lane-padded LSTM hidden dim (multiple of 128)
    G = 4 * Hp

    # --- Hoisted, time-parallel input projection (bf16 operands, f32 accumulation). ---
    # x block is time-major (T, TB, D) with TB % 8 == 0, so collapsing the leading dims is
    # sublane-aligned.  Biases (b_ih + b_hh) are pre-summed and folded in here once.
    x_all = x_ref[...].reshape(T * TB, D)
    xp = jnp.dot(x_all, wih_ref[...], preferred_element_type=jnp.float32) + b_ref[...]
    xp_ref[...] = xp.reshape(T, TB, G)        # stage in VMEM scratch; per-step read is a free view

    # --- LSTM recurrence, fully unrolled (T static & small); h/c live in vregs, f32. ---
    # TODO(synk): if T grows beyond ~16, switch to lax.fori_loop(..., unroll=<small>) reading
    # xp_ref[t] to avoid vreg/code-size blowup from full unrolling.
    h = jnp.zeros((TB, Hp), jnp.float32)
    c = jnp.zeros((TB, Hp), jnp.float32)
    for t in range(T):                                         # static -> static ref index
        gates = xp_ref[t] + jnp.dot(h.astype(jnp.bfloat16), whh_ref[...],
                                    preferred_element_type=jnp.float32)
        # Gate pack order (i, f, o, g): one sigmoid covers the first 3 blocks, one tanh the last.
        sig = jax.nn.sigmoid(gates[:, :3 * Hp])
        g_g = jnp.tanh(gates[:, 3 * Hp:])
        i_g = sig[:, 0 * Hp:1 * Hp]
        f_g = sig[:, 1 * Hp:2 * Hp]
        o_g = sig[:, 2 * Hp:3 * Hp]
        c = f_g * c + i_g * g_g
        h = o_g * jnp.tanh(c)

    # --- FC head on lstm_out[:, -1, :] == h (padded lanes of h are exactly 0). ---
    z = jnp.dot(h.astype(jnp.bfloat16), w1_ref[...],
                preferred_element_type=jnp.float32) + b1_ref[...]
    z = jnp.maximum(z, 0.0)
    # TODO(synk): Dropout(p=0.3) is identity at inference; training-mode dropout not implemented.
    # Final Linear(hidden, 1): VPU multiply + cross-lane sum (skip an N=1 MXU matmul).
    y = jnp.sum(z * w2_ref[...], axis=-1, keepdims=True) + b2_ref[...]
    out_ref[...] = y.astype(out_ref.dtype)


def meta_classifier_forward(x, params, *, block_b=None):
    """x: (B, T, D) float32, batch_first — same contract as the PyTorch module.

    params are in PyTorch layouts:
      w_ih (4H, D), w_hh (4H, H), b_ih (4H,), b_hh (4H,)   [gate order i, f, g, o]
      w1 (HID, H), b1 (HID,), w2 (1, HID), b2 (1,)
    """
    B, T, D = x.shape
    w_ih, w_hh, b_ih, b_hh, w1, b1, w2, b2 = params
    H = w_hh.shape[1]             # lstm_hidden_dim
    HID = w1.shape[0]             # fc hidden dim
    Hp = _round_up(H, 128)        # pad so each gate block occupies a full 128-lane slot
    pad_h = Hp - H

    # --- One-time weight preprocessing (wrapper side): reorder gates (i,f,g,o)->(i,f,o,g),
    #     lane-pad gate blocks, transpose to (in, out), pre-sum biases, cast MXU weights to bf16.
    perm = jnp.array([0, 1, 3, 2], jnp.int32)

    def pack_gates(w, in_dim):            # (4H, in_dim) torch layout -> (in_dim, 4*Hp)
        w4 = w.reshape(4, H, in_dim)[perm]
        w4 = jnp.pad(w4, ((0, 0), (0, pad_h), (0, 0)))
        return w4.reshape(4 * Hp, in_dim).T

    wih_p = pack_gates(w_ih, D).astype(jnp.bfloat16)                       # (D, 4*Hp)
    whh_p = jnp.pad(pack_gates(w_hh, H), ((0, pad_h), (0, 0))
                    ).astype(jnp.bfloat16)                                 # (Hp, 4*Hp)
    b_p = jnp.pad((b_ih + b_hh).reshape(4, H)[perm],
                  ((0, 0), (0, pad_h))).reshape(1, 4 * Hp).astype(jnp.float32)
    w1_p = jnp.pad(w1.T, ((0, pad_h), (0, 0))).astype(jnp.bfloat16)        # (Hp, HID)
    b1_p = b1.reshape(1, HID).astype(jnp.float32)
    w2_p = w2.reshape(1, HID).astype(jnp.float32)                          # used on the VPU path
    b2_p = b2.reshape(1, 1).astype(jnp.float32)

    # --- Batch tiling: time-major x, batch padded to a multiple of the tile (>= 8 sublanes). ---
    TB = block_b if block_b is not None else min(256, _round_up(B, 8))
    TB = _round_up(TB, 8)
    Bp = _round_up(B, TB)
    x_tm = jnp.transpose(x, (1, 0, 2)).astype(jnp.bfloat16)                # (T, B, D)
    x_tm = jnp.pad(x_tm, ((0, 0), (0, Bp - B), (0, 0)))                    # (T, Bp, D)

    grid = (Bp // TB,)
    const2 = lambda i: (0, 0)

    out = pl.pallas_call(
        _meta_classifier_kernel,
        out_shape=jax.ShapeDtypeStruct((Bp, 1), jnp.float32),
        grid=grid,
        in_specs=[
            pl.BlockSpec((T, TB, D), lambda i: (0, i, 0)),   # x: streams per batch block
            pl.BlockSpec(wih_p.shape, const2),               # weights: constant map -> resident
            pl.BlockSpec(whh_p.shape, const2),
            pl.BlockSpec(b_p.shape, const2),
            pl.BlockSpec(w1_p.shape, const2),
            pl.BlockSpec(b1_p.shape, const2),
            pl.BlockSpec(w2_p.shape, const2),
            pl.BlockSpec(b2_p.shape, const2),
        ],
        out_specs=pl.BlockSpec((TB, 1), lambda i: (i, 0)),
        scratch_shapes=[pltpu.VMEM((T, TB, 4 * Hp), jnp.float32)],         # xp staging
        compiler_params=pltpu.CompilerParams(
            dimension_semantics=("parallel",)),              # megacore-shard batch on v7x
    )(x_tm, wih_p, whh_p, b_p, w1_p, b1_p, w2_p, b2_p)
    return out[:B]


def make_params(key, input_dim, hidden_dim, lstm_hidden_dim):
    """Random params in PyTorch's native layouts (gate order i, f, g, o)."""
    ks = jax.random.split(key, 8)
    s = 0.1
    H, HID, D = lstm_hidden_dim, hidden_dim, input_dim
    w_ih = s * jax.random.normal(ks[0], (4 * H, D), jnp.float32)
    w_hh = s * jax.random.normal(ks[1], (4 * H, H), jnp.float32)
    b_ih = s * jax.random.normal(ks[2], (4 * H,), jnp.float32)
    b_hh = s * jax.random.normal(ks[3], (4 * H,), jnp.float32)
    w1 = s * jax.random.normal(ks[4], (HID, H), jnp.float32)
    b1 = s * jax.random.normal(ks[5], (HID,), jnp.float32)
    w2 = s * jax.random.normal(ks[6], (1, HID), jnp.float32)
    b2 = s * jax.random.normal(ks[7], (1,), jnp.float32)
    return (w_ih, w_hh, b_ih, b_hh, w1, b1, w2, b2)


def reference_forward(x, params):
    """Pure-f32 JAX reference with exact PyTorch nn.LSTM / nn.Linear semantics."""
    w_ih, w_hh, b_ih, b_hh, w1, b1, w2, b2 = params
    B, T, D = x.shape
    H = w_hh.shape[1]
    h = jnp.zeros((B, H), jnp.float32)
    c = jnp.zeros((B, H), jnp.float32)
    for t in range(T):
        g = x[:, t, :] @ w_ih.T + h @ w_hh.T + b_ih + b_hh
        i_g = jax.nn.sigmoid(g[:, 0 * H:1 * H])
        f_g = jax.nn.sigmoid(g[:, 1 * H:2 * H])
        g_g = jnp.tanh(g[:, 2 * H:3 * H])
        o_g = jax.nn.sigmoid(g[:, 3 * H:4 * H])
        c = f_g * c + i_g * g_g
        h = o_g * jnp.tanh(c)
    z = jnp.maximum(h @ w1.T + b1, 0.0)
    return z @ w2.T + b2


if __name__ == "__main__":
    B, T, input_dim = 2, 8, 32
    hidden_dim, lstm_hidden_dim = 128, 64

    key = jax.random.PRNGKey(0)
    kx, kp = jax.random.split(key)
    x = jax.random.normal(kx, (B, T, input_dim), jnp.float32)
    params = make_params(kp, input_dim, hidden_dim, lstm_hidden_dim)

    out = meta_classifier_forward(x, params)
    out = jax.block_until_ready(out)

    ref = reference_forward(x, params)
    assert out.shape == (B, 1), out.shape
    # bf16 MXU operands (per perf review) -> tolerance loosened vs. the pure-f32 reference.
    assert jnp.allclose(out, ref, atol=2e-2, rtol=2e-2), (out, ref)

    print("KERNEL_OK")
</pallas_src>

<mosaic_0001>
module attributes {stable_mosaic.version = 11 : i64} {
  func.func @_meta_classifier_kernel(%arg0: i32, %arg1: memref<8x8x32xbf16, #tpu.memory_space<vmem>>, %arg2: memref<32x512xbf16, #tpu.memory_space<vmem>>, %arg3: memref<128x512xbf16, #tpu.memory_space<vmem>>, %arg4: memref<1x512xf32, #tpu.memory_space<vmem>>, %arg5: memref<128x128xbf16, #tpu.memory_space<vmem>>, %arg6: memref<1x128xf32, #tpu.memory_space<vmem>>, %arg7: memref<1x128xf32, #tpu.memory_space<vmem>>, %arg8: memref<1x1xf32, #tpu.memory_space<vmem>>, %arg9: memref<8x1xf32, #tpu.memory_space<vmem>>, %arg10: memref<8x8x512xf32, #tpu.memory_space<vmem>>) attributes {dimension_semantics = [#tpu.dimension_semantics<parallel>], iteration_bounds = array<i64: 1>, scalar_prefetch = 0 : i64, scratch_operands = 1 : i64, tpu.core_type = #tpu.core_type<tc>, window_params = [{transform_indices = @transform_0, window_bounds = array<i64: 8, 8, 32>}, {pipeline_mode = #tpu.pipeline_mode<synchronous>, transform_indices = @transform_1, window_bounds = array<i64: 32, 512>}, {pipeline_mode = #tpu.pipeline_mode<synchronous>, transform_indices = @transform_2, window_bounds = array<i64: 128, 512>}, {pipeline_mode = #tpu.pipeline_mode<synchronous>, transform_indices = @transform_3, window_bounds = array<i64: 1, 512>}, {pipeline_mode = #tpu.pipeline_mode<synchronous>, transform_indices = @transform_4, window_bounds = array<i64: 128, 128>}, {pipeline_mode = #tpu.pipeline_mode<synchronous>, transform_indices = @transform_5, window_bounds = array<i64: 1, 128>}, {pipeline_mode = #tpu.pipeline_mode<synchronous>, transform_indices = @transform_6, window_bounds = array<i64: 1, 128>}, {pipeline_mode = #tpu.pipeline_mode<synchronous>, transform_indices = @transform_7, window_bounds = array<i64: 1, 1>}, {transform_indices = @transform_8, window_bounds = array<i64: 8, 1>}]} {
    %c0 = arith.constant 0 : index
    %c0_0 = arith.constant 0 : index
    %c0_1 = arith.constant 0 : index
    %0 = vector.load %arg1[%c0, %c0_0, %c0_1] : memref<8x8x32xbf16, #tpu.memory_space<vmem>>, vector<8x8x32xbf16>
    %1 = vector.shape_cast %0 : vector<8x8x32xbf16> to vector<64x32xbf16>
    %c0_2 = arith.constant 0 : index
    %c0_3 = arith.constant 0 : index
    %2 = vector.load %arg2[%c0_2, %c0_3] : memref<32x512xbf16, #tpu.memory_space<vmem>>, vector<32x512xbf16>
    %cst = arith.constant dense<0.000000e+00> : vector<64x512xf32>
    %3 = tpu.matmul %1, %2, %cst {dimension_numbers = #tpu.dot_dimension_numbers<[1], [0], [0], [1], [0, 0, 1, 1], [], []>} : vector<64x32xbf16>, vector<32x512xbf16>, vector<64x512xf32> -> vector<64x512xf32>
    %c0_4 = arith.constant 0 : index
    %c0_5 = arith.constant 0 : index
    %4 = vector.load %arg4[%c0_4, %c0_5] : memref<1x512xf32, #tpu.memory_space<vmem>>, vector<1x512xf32>
    %5 = vector.broadcast %4 : vector<1x512xf32> to vector<64x512xf32>
    %6 = arith.addf %3, %5 : vector<64x512xf32>
    %7 = vector.shape_cast %6 : vector<64x512xf32> to vector<8x8x512xf32>
    %c0_6 = arith.constant 0 : index
    %c0_7 = arith.constant 0 : index
    %c0_8 = arith.constant 0 : index
    %8 = vector.load %arg10[%c0_6, %c0_7, %c0_8] : memref<8x8x512xf32, #tpu.memory_space<vmem>>, vector<8x8x512xf32>
    tpu.vector_store %arg10[%c0_6, %c0_7, %c0_8], %7 {strides = array<i32>} : memref<8x8x512xf32, #tpu.memory_space<vmem>>, vector<8x8x512xf32>,
    %cst_9 = arith.constant 0.000000e+00 : f32
    %9 = vector.broadcast %cst_9 : f32 to vector<8x128xf32>
    %cst_10 = arith.constant 0.000000e+00 : f32
    %10 = vector.broadcast %cst_10 : f32 to vector<8x128xf32>
    %c0_11 = arith.constant 0 : index
    %c0_12 = arith.constant 0 : index
    %c0_13 = arith.constant 0 : index
    %11 = vector.load %arg10[%c0_11, %c0_12, %c0_13] : memref<8x8x512xf32, #tpu.memory_space<vmem>>, vector<1x8x512xf32>
    %12 = vector.shape_cast %11 : vector<1x8x512xf32> to vector<8x512xf32>
    %13 = arith.truncf %9 : vector<8x128xf32> to vector<8x128xbf16>
    %c0_14 = arith.constant 0 : index
    %c0_15 = arith.constant 0 : index
    %14 = vector.load %arg3[%c0_14, %c0_15] : memref<128x512xbf16, #tpu.memory_space<vmem>>, vector<128x512xbf16>
    %cst_16 = arith.constant dense<0.000000e+00> : vector<8x512xf32>
    %15 = tpu.matmul %13, %14, %cst_16 {dimension_numbers = #tpu.dot_dimension_numbers<[1], [0], [0], [1], [0, 0, 1, 1], [], []>} : vector<8x128xbf16>, vector<128x512xbf16>, vector<8x512xf32> -> vector<8x512xf32>
    %16 = arith.addf %12, %15 : vector<8x512xf32>
    %17 = vector.extract_strided_slice %16 {offsets = [0, 0], sizes = [8, 384], strides = [1, 1]} : vector<8x512xf32> to vector<8x384xf32>
    %18 = arith.negf %17 : vector<8x384xf32>
    %19 = math.exp %18 : vector<8x384xf32>
    %cst_17 = arith.constant 1.000000e+00 : f32
    %20 = vector.broadcast %cst_17 : f32 to vector<8x384xf32>
    %21 = arith.addf %20, %19 : vector<8x384xf32>
    %22 = arith.divf %20, %21 : vector<8x384xf32>
    %23 = vector.extract_strided_slice %16 {offsets = [0, 384], sizes = [8, 128], strides = [1, 1]} : vector<8x512xf32> to vector<8x128xf32>
    %24 = math.tanh %23 : vector<8x128xf32>
    %25 = vector.extract_strided_slice %22 {offsets = [0, 0], sizes = [8, 128], strides = [1, 1]} : vector<8x384xf32> to vector<8x128xf32>
    %26 = vector.extract_strided_slice %22 {offsets = [0, 128], sizes = [8, 128], strides = [1, 1]} : vector<8x384xf32> to vector<8x128xf32>
    %27 = vector.extract_strided_slice %22 {offsets = [0, 256], sizes = [8, 128], strides = [1, 1]} : vector<8x384xf32> to vector<8x128xf32>
    %28 = arith.mulf %26, %10 : vector<8x128xf32>
    %29 = arith.mulf %25, %24 : vector<8x128xf32>
    %30 = arith.addf %28, %29 : vector<8x128xf32>
    %31 = math.tanh %30 : vector<8x128xf32>
    %32 = arith.mulf %27, %31 : vector<8x128xf32>
    %c1 = arith.constant 1 : index
    %c0_18 = arith.constant 0 : index
    %c0_19 = arith.constant 0 : index
    %33 = vector.load %arg10[%c1, %c0_18, %c0_19] : memref<8x8x512xf32, #tpu.memory_space<vmem>>, vector<1x8x512xf32>
    %34 = vector.shape_cast %33 : vector<1x8x512xf32> to vector<8x512xf32>
    %35 = arith.truncf %32 : vector<8x128xf32> to vector<8x128xbf16>
    %c0_20 = arith.constant 0 : index
    %c0_21 = arith.constant 0 : index
    %36 = vector.load %arg3[%c0_20, %c0_21] : memref<128x512xbf16, #tpu.memory_space<vmem>>, vector<128x512xbf16>
    %cst_22 = arith.constant dense<0.000000e+00> : vector<8x512xf32>
    %37 = tpu.matmul %35, %36, %cst_22 {dimension_numbers = #tpu.dot_dimension_numbers<[1], [0], [0], [1], [0, 0, 1, 1], [], []>} : vector<8x128xbf16>, vector<128x512xbf16>, vector<8x512xf32> -> vector<8x512xf32>
    %38 = arith.addf %34, %37 : vector<8x512xf32>
    %39 = vector.extract_strided_slice %38 {offsets = [0, 0], sizes = [8, 384], strides = [1, 1]} : vector<8x512xf32> to vector<8x384xf32>
    %40 = arith.negf %39 : vector<8x384xf32>
    %41 = math.exp %40 : vector<8x384xf32>
    %cst_23 = arith.constant 1.000000e+00 : f32
    %42 = vector.broadcast %cst_23 : f32 to vector<8x384xf32>
    %43 = arith.addf %42, %41 : vector<8x384xf32>
    %44 = arith.divf %42, %43 : vector<8x384xf32>
    %45 = vector.extract_strided_slice %38 {offsets = [0, 384], sizes = [8, 128], strides = [1, 1]} : vector<8x512xf32> to vector<8x128xf32>
    %46 = math.tanh %45 : vector<8x128xf32>
    %47 = vector.extract_strided_slice %44 {offsets = [0, 0], sizes = [8, 128], strides = [1, 1]} : vector<8x384xf32> to vector<8x128xf32>
    %48 = vector.extract_strided_slice %44 {offsets = [0, 128], sizes = [8, 128], strides = [1, 1]} : vector<8x384xf32> to vector<8x128xf32>
    %49 = vector.extract_strided_slice %44 {offsets = [0, 256], sizes = [8, 128], strides = [1, 1]} : vector<8x384xf32> to vector<8x128xf32>
    %50 = arith.mulf %48, %30 : vector<8x128xf32>
    %51 = arith.mulf %47, %46 : vector<8x128xf32>
    %52 = arith.addf %50, %51 : vector<8x128xf32>
    %53 = math.tanh %52 : vector<8x128xf32>
    %54 = arith.mulf %49, %53 : vector<8x128xf32>
    %c2 = arith.constant 2 : index
    %c0_24 = arith.constant 0 : index
    %c0_25 = arith.constant 0 : index
    %55 = vector.load %arg10[%c2, %c0_24, %c0_25] : memref<8x8x512xf32, #tpu.memory_space<vmem>>, vector<1x8x512xf32>
    %56 = vector.shape_cast %55 : vector<1x8x512xf32> to vector<8x512xf32>
    %57 = arith.truncf %54 : vector<8x128xf32> to vector<8x128xbf16>
    %c0_26 = arith.constant 0 : index
    %c0_27 = arith.constant 0 : index
    %58 = vector.load %arg3[%c0_26, %c0_27] : memref<128x512xbf16, #tpu.memory_space<vmem>>, vector<128x512xbf16>
    %cst_28 = arith.constant dense<0.000000e+00> : vector<8x512xf32>
    %59 = tpu.matmul %57, %58, %cst_28 {dimension_numbers = #tpu.dot_dimension_numbers<[1], [0], [0], [1], [0, 0, 1, 1], [], []>} : vector<8x128xbf16>, vector<128x512xbf16>, vector<8x512xf32> -> vector<8x512xf32>
    %60 = arith.addf %56, %59 : vector<8x512xf32>
    %61 = vector.extract_strided_slice %60 {offsets = [0, 0], sizes = [8, 384], strides = [1, 1]} : vector<8x512xf32> to vector<8x384xf32>
    %62 = arith.negf %61 : vector<8x384xf32>
    %63 = math.exp %62 : vector<8x384xf32>
    %cst_29 = arith.constant 1.000000e+00 : f32
    %64 = vector.broadcast %cst_29 : f32 to vector<8x384xf32>
    %65 = arith.addf %64, %63 : vector<8x384xf32>
    %66 = arith.divf %64, %65 : vector<8x384xf32>
    %67 = vector.extract_strided_slice %60 {offsets = [0, 384], sizes = [8, 128], strides = [1, 1]} : vector<8x512xf32> to vector<8x128xf32>
    %68 = math.tanh %67 : vector<8x128xf32>
    %69 = vector.extract_strided_slice %66 {offsets = [0, 0], sizes = [8, 128], strides = [1, 1]} : vector<8x384xf32> to vector<8x128xf32>
    %70 = vector.extract_strided_slice %66 {offsets = [0, 128], sizes = [8, 128], strides = [1, 1]} : vector<8x384xf32> to vector<8x128xf32>
    %71 = vector.extract_strided_slice %66 {offsets = [0, 256], sizes = [8, 128], strides = [1, 1]} : vector<8x384xf32> to vector<8x128xf32>
    %72 = arith.mulf %70, %52 : vector<8x128xf32>
    %73 = arith.mulf %69, %68 : vector<8x128xf32>
    %74 = arith.addf %72, %73 : vector<8x128xf32>
    %75 = math.tanh %74 : vector<8x128xf32>
    %76 = arith.mulf %71, %75 : vector<8x128xf32>
    %c3 = arith.constant 3 : index
    %c0_30 = arith.constant 0 : index
    %c0_31 = arith.constant 0 : index
    %77 = vector.load %arg10[%c3, %c0_30, %c0_31] : memref<8x8x512xf32, #tpu.memory_space<vmem>>, vector<1x8x512xf32>
    %78 = vector.shape_cast %77 : vector<1x8x512xf32> to vector<8x512xf32>
    %79 = arith.truncf %76 : vector<8x128xf32> to vector<8x128xbf16>
    %c0_32 = arith.constant 0 : index
    %c0_33 = arith.constant 0 : index
    %80 = vector.load %arg3[%c0_32, %c0_33] : memref<128x512xbf16, #tpu.memory_space<vmem>>, vector<128x512xbf16>
    %cst_34 = arith.constant dense<0.000000e+00> : vector<8x512xf32>
    %81 = tpu.matmul %79, %80, %cst_34 {dimension_numbers = #tpu.dot_dimension_numbers<[1], [0], [0], [1], [0, 0, 1, 1], [], []>} : vector<8x128xbf16>, vector<128x512xbf16>, vector<8x512xf32> -> vector<8x512xf32>
    %82 = arith.addf %78, %81 : vector<8x512xf32>
    %83 = vector.extract_strided_slice %82 {offsets = [0, 0], sizes = [8, 384], strides = [1, 1]} : vector<8x512xf32> to vector<8x384xf32>
    %84 = arith.negf %83 : vector<8x384xf32>
    %85 = math.exp %84 : vector<8x384xf32>
    %cst_35 = arith.constant 1.000000e+00 : f32
    %86 = vector.broadcast %cst_35 : f32 to vector<8x384xf32>
    %87 = arith.addf %86, %85 : vector<8x384xf32>
    %88 = arith.divf %86, %87 : vector<8x384xf32>
    %89 = vector.extract_strided_slice %82 {offsets = [0, 384], sizes = [8, 128], strides = [1, 1]} : vector<8x512xf32> to vector<8x128xf32>
    %90 = math.tanh %89 : vector<8x128xf32>
    %91 = vector.extract_strided_slice %88 {offsets = [0, 0], sizes = [8, 128], strides = [1, 1]} : vector<8x384xf32> to vector<8x128xf32>
    %92 = vector.extract_strided_slice %88 {offsets = [0, 128], sizes = [8, 128], strides = [1, 1]} : vector<8x384xf32> to vector<8x128xf32>
    %93 = vector.extract_strided_slice %88 {offsets = [0, 256], sizes = [8, 128], strides = [1, 1]} : vector<8x384xf32> to vector<8x128xf32>
    %94 = arith.mulf %92, %74 : vector<8x128xf32>
    %95 = arith.mulf %91, %90 : vector<8x128xf32>
    %96 = arith.addf %94, %95 : vector<8x128xf32>
    %97 = math.tanh %96 : vector<8x128xf32>
    %98 = arith.mulf %93, %97 : vector<8x128xf32>
    %c4 = arith.constant 4 : index
    %c0_36 = arith.constant 0 : index
    %c0_37 = arith.constant 0 : index
    %99 = vector.load %arg10[%c4, %c0_36, %c0_37] : memref<8x8x512xf32, #tpu.memory_space<vmem>>, vector<1x8x512xf32>
    %100 = vector.shape_cast %99 : vector<1x8x512xf32> to vector<8x512xf32>
    %101 = arith.truncf %98 : vector<8x128xf32> to vector<8x128xbf16>
    %c0_38 = arith.constant 0 : index
    %c0_39 = arith.constant 0 : index
    %102 = vector.load %arg3[%c0_38, %c0_39] : memref<128x512xbf16, #tpu.memory_space<vmem>>, vector<128x512xbf16>
    %cst_40 = arith.constant dense<0.000000e+00> : vector<8x512xf32>
    %103 = tpu.matmul %101, %102, %cst_40 {dimension_numbers = #tpu.dot_dimension_numbers<[1], [0], [0], [1], [0, 0, 1, 1], [], []>} : vector<8x128xbf16>, vector<128x512xbf16>, vector<8x512xf32> -> vector<8x512xf32>
    %104 = arith.addf %100, %103 : vector<8x512xf32>
    %105 = vector.extract_strided_slice %104 {offsets = [0, 0], sizes = [8, 384], strides = [1, 1]} : vector<8x512xf32> to vector<8x384xf32>
    %106 = arith.negf %105 : vector<8x384xf32>
    %107 = math.exp %106 : vector<8x384xf32>
    %cst_41 = arith.constant 1.000000e+00 : f32
    %108 = vector.broadcast %cst_41 : f32 to vector<8x384xf32>
    %109 = arith.addf %108, %107 : vector<8x384xf32>
    %110 = arith.divf %108, %109 : vector<8x384xf32>
    %111 = vector.extract_strided_slice %104 {offsets = [0, 384], sizes = [8, 128], strides = [1, 1]} : vector<8x512xf32> to vector<8x128xf32>
    %112 = math.tanh %111 : vector<8x128xf32>
    %113 = vector.extract_strided_slice %110 {offsets = [0, 0], sizes = [8, 128], strides = [1, 1]} : vector<8x384xf32> to vector<8x128xf32>
    %114 = vector.extract_strided_slice %110 {offsets = [0, 128], sizes = [8, 128], strides = [1, 1]} : vector<8x384xf32> to vector<8x128xf32>
    %115 = vector.extract_strided_slice %110 {offsets = [0, 256], sizes = [8, 128], strides = [1, 1]} : vector<8x384xf32> to vector<8x128xf32>
    %116 = arith.mulf %114, %96 : vector<8x128xf32>
    %117 = arith.mulf %113, %112 : vector<8x128xf32>
    %118 = arith.addf %116, %117 : vector<8x128xf32>
    %119 = math.tanh %118 : vector<8x128xf32>
    %120 = arith.mulf %115, %119 : vector<8x128xf32>
    %c5 = arith.constant 5 : index
    %c0_42 = arith.constant 0 : index
    %c0_43 = arith.constant 0 : index
    %121 = vector.load %arg10[%c5, %c0_42, %c0_43] : memref<8x8x512xf32, #tpu.memory_space<vmem>>, vector<1x8x512xf32>
    %122 = vector.shape_cast %121 : vector<1x8x512xf32> to vector<8x512xf32>
    %123 = arith.truncf %120 : vector<8x128xf32> to vector<8x128xbf16>
    %c0_44 = arith.constant 0 : index
    %c0_45 = arith.constant 0 : index
    %124 = vector.load %arg3[%c0_44, %c0_45] : memref<128x512xbf16, #tpu.memory_space<vmem>>, vector<128x512xbf16>
    %cst_46 = arith.constant dense<0.000000e+00> : vector<8x512xf32>
    %125 = tpu.matmul %123, %124, %cst_46 {dimension_numbers = #tpu.dot_dimension_numbers<[1], [0], [0], [1], [0, 0, 1, 1], [], []>} : vector<8x128xbf16>, vector<128x512xbf16>, vector<8x512xf32> -> vector<8x512xf32>
    %126 = arith.addf %122, %125 : vector<8x512xf32>
    %127 = vector.extract_strided_slice %126 {offsets = [0, 0], sizes = [8, 384], strides = [1, 1]} : vector<8x512xf32> to vector<8x384xf32>
    %128 = arith.negf %127 : vector<8x384xf32>
    %129 = math.exp %128 : vector<8x384xf32>
    %cst_47 = arith.constant 1.000000e+00 : f32
    %130 = vector.broadcast %cst_47 : f32 to vector<8x384xf32>
    %131 = arith.addf %130, %129 : vector<8x384xf32>
    %132 = arith.divf %130, %131 : vector<8x384xf32>
    %133 = vector.extract_strided_slice %126 {offsets = [0, 384], sizes = [8, 128], strides = [1, 1]} : vector<8x512xf32> to vector<8x128xf32>
    %134 = math.tanh %133 : vector<8x128xf32>
    %135 = vector.extract_strided_slice %132 {offsets = [0, 0], sizes = [8, 128], strides = [1, 1]} : vector<8x384xf32> to vector<8x128xf32>
    %136 = vector.extract_strided_slice %132 {offsets = [0, 128], sizes = [8, 128], strides = [1, 1]} : vector<8x384xf32> to vector<8x128xf32>
    %137 = vector.extract_strided_slice %132 {offsets = [0, 256], sizes = [8, 128], strides = [1, 1]} : vector<8x384xf32> to vector<8x128xf32>
    %138 = arith.mulf %136, %118 : vector<8x128xf32>
    %139 = arith.mulf %135, %134 : vector<8x128xf32>
    %140 = arith.addf %138, %139 : vector<8x128xf32>
    %141 = math.tanh %140 : vector<8x128xf32>
    %142 = arith.mulf %137, %141 : vector<8x128xf32>
    %c6 = arith.constant 6 : index
    %c0_48 = arith.constant 0 : index
    %c0_49 = arith.constant 0 : index
    %143 = vector.load %arg10[%c6, %c0_48, %c0_49] : memref<8x8x512xf32, #tpu.memory_space<vmem>>, vector<1x8x512xf32>
    %144 = vector.shape_cast %143 : vector<1x8x512xf32> to vector<8x512xf32>
    %145 = arith.truncf %142 : vector<8x128xf32> to vector<8x128xbf16>
    %c0_50 = arith.constant 0 : index
    %c0_51 = arith.constant 0 : index
    %146 = vector.load %arg3[%c0_50, %c0_51] : memref<128x512xbf16, #tpu.memory_space<vmem>>, vector<128x512xbf16>
    %cst_52 = arith.constant dense<0.000000e+00> : vector<8x512xf32>
    %147 = tpu.matmul %145, %146, %cst_52 {dimension_numbers = #tpu.dot_dimension_numbers<[1], [0], [0], [1], [0, 0, 1, 1], [], []>} : vector<8x128xbf16>, vector<128x512xbf16>, vector<8x512xf32> -> vector<8x512xf32>
    %148 = arith.addf %144, %147 : vector<8x512xf32>
    %149 = vector.extract_strided_slice %148 {offsets = [0, 0], sizes = [8, 384], strides = [1, 1]} : vector<8x512xf32> to vector<8x384xf32>
    %150 = arith.negf %149 : vector<8x384xf32>
    %151 = math.exp %150 : vector<8x384xf32>
    %cst_53 = arith.constant 1.000000e+00 : f32
    %152 = vector.broadcast %cst_53 : f32 to vector<8x384xf32>
    %153 = arith.addf %152, %151 : vector<8x384xf32>
    %154 = arith.divf %152, %153 : vector<8x384xf32>
    %155 = vector.extract_strided_slice %148 {offsets = [0, 384], sizes = [8, 128], strides = [1, 1]} : vector<8x512xf32> to vector<8x128xf32>
    %156 = math.tanh %155 : vector<8x128xf32>
    %157 = vector.extract_strided_slice %154 {offsets = [0, 0], sizes = [8, 128], strides = [1, 1]} : vector<8x384xf32> to vector<8x128xf32>
    %158 = vector.extract_strided_slice %154 {offsets = [0, 128], sizes = [8, 128], strides = [1, 1]} : vector<8x384xf32> to vector<8x128xf32>
    %159 = vector.extract_strided_slice %154 {offsets = [0, 256], sizes = [8, 128], strides = [1, 1]} : vector<8x384xf32> to vector<8x128xf32>
    %160 = arith.mulf %158, %140 : vector<8x128xf32>
    %161 = arith.mulf %157, %156 : vector<8x128xf32>
    %162 = arith.addf %160, %161 : vector<8x128xf32>
    %163 = math.tanh %162 : vector<8x128xf32>
    %164 = arith.mulf %159, %163 : vector<8x128xf32>
    %c7 = arith.constant 7 : index
    %c0_54 = arith.constant 0 : index
    %c0_55 = arith.constant 0 : index
    %165 = vector.load %arg10[%c7, %c0_54, %c0_55] : memref<8x8x512xf32, #tpu.memory_space<vmem>>, vector<1x8x512xf32>
    %166 = vector.shape_cast %165 : vector<1x8x512xf32> to vector<8x512xf32>
    %167 = arith.truncf %164 : vector<8x128xf32> to vector<8x128xbf16>
    %c0_56 = arith.constant 0 : index
    %c0_57 = arith.constant 0 : index
    %168 = vector.load %arg3[%c0_56, %c0_57] : memref<128x512xbf16, #tpu.memory_space<vmem>>, vector<128x512xbf16>
    %cst_58 = arith.constant dense<0.000000e+00> : vector<8x512xf32>
    %169 = tpu.matmul %167, %168, %cst_58 {dimension_numbers = #tpu.dot_dimension_numbers<[1], [0], [0], [1], [0, 0, 1, 1], [], []>} : vector<8x128xbf16>, vector<128x512xbf16>, vector<8x512xf32> -> vector<8x512xf32>
    %170 = arith.addf %166, %169 : vector<8x512xf32>
    %171 = vector.extract_strided_slice %170 {offsets = [0, 0], sizes = [8, 384], strides = [1, 1]} : vector<8x512xf32> to vector<8x384xf32>
    %172 = arith.negf %171 : vector<8x384xf32>
    %173 = math.exp %172 : vector<8x384xf32>
    %cst_59 = arith.constant 1.000000e+00 : f32
    %174 = vector.broadcast %cst_59 : f32 to vector<8x384xf32>
    %175 = arith.addf %174, %173 : vector<8x384xf32>
    %176 = arith.divf %174, %175 : vector<8x384xf32>
    %177 = vector.extract_strided_slice %170 {offsets = [0, 384], sizes = [8, 128], strides = [1, 1]} : vector<8x512xf32> to vector<8x128xf32>
    %178 = math.tanh %177 : vector<8x128xf32>
    %179 = vector.extract_strided_slice %176 {offsets = [0, 0], sizes = [8, 128], strides = [1, 1]} : vector<8x384xf32> to vector<8x128xf32>
    %180 = vector.extract_strided_slice %176 {offsets = [0, 128], sizes = [8, 128], strides = [1, 1]} : vector<8x384xf32> to vector<8x128xf32>
    %181 = vector.extract_strided_slice %176 {offsets = [0, 256], sizes = [8, 128], strides = [1, 1]} : vector<8x384xf32> to vector<8x128xf32>
    %182 = arith.mulf %180, %162 : vector<8x128xf32>
    %183 = arith.mulf %179, %178 : vector<8x128xf32>
    %184 = arith.addf %182, %183 : vector<8x128xf32>
    %185 = math.tanh %184 : vector<8x128xf32>
    %186 = arith.mulf %181, %185 : vector<8x128xf32>
    %187 = arith.truncf %186 : vector<8x128xf32> to vector<8x128xbf16>
    %c0_60 = arith.constant 0 : index
    %c0_61 = arith.constant 0 : index
    %188 = vector.load %arg5[%c0_60, %c0_61] : memref<128x128xbf16, #tpu.memory_space<vmem>>, vector<128x128xbf16>
    %cst_62 = arith.constant dense<0.000000e+00> : vector<8x128xf32>
    %189 = tpu.matmul %187, %188, %cst_62 {dimension_numbers = #tpu.dot_dimension_numbers<[1], [0], [0], [1], [0, 0, 1, 1], [], []>} : vector<8x128xbf16>, vector<128x128xbf16>, vector<8x128xf32> -> vector<8x128xf32>
    %c0_63 = arith.constant 0 : index
    %c0_64 = arith.constant 0 : index
    %190 = vector.load %arg6[%c0_63, %c0_64] : memref<1x128xf32, #tpu.memory_space<vmem>>, vector<1x128xf32>
    %191 = vector.broadcast %190 : vector<1x128xf32> to vector<8x128xf32>
    %192 = arith.addf %189, %191 : vector<8x128xf32>
    %cst_65 = arith.constant 0.000000e+00 : f32
    %193 = vector.broadcast %cst_65 : f32 to vector<8x128xf32>
    %194 = arith.maximumf %192, %193 : vector<8x128xf32>
    %c0_66 = arith.constant 0 : index
    %c0_67 = arith.constant 0 : index
    %195 = vector.load %arg7[%c0_66, %c0_67] : memref<1x128xf32, #tpu.memory_space<vmem>>, vector<1x128xf32>
    %196 = vector.broadcast %195 : vector<1x128xf32> to vector<8x128xf32>
    %197 = arith.mulf %194, %196 : vector<8x128xf32>
    %cst_68 = arith.constant dense<0.000000e+00> : vector<8xf32>
    %198 = vector.multi_reduction <add>, %197, %cst_68 [1] : vector<8x128xf32> to vector<8xf32>
    %199 = vector.shape_cast %198 : vector<8xf32> to vector<8x1xf32>
    %c0_69 = arith.constant 0 : index
    %c0_70 = arith.constant 0 : index
    %200 = vector.load %arg8[%c0_69, %c0_70] : memref<1x1xf32, #tpu.memory_space<vmem>>, vector<1x1xf32>
    %201 = vector.broadcast %200 : vector<1x1xf32> to vector<8x1xf32>
    %202 = arith.addf %199, %201 : vector<8x1xf32>
    %c0_71 = arith.constant 0 : index
    %c0_72 = arith.constant 0 : index
    %203 = vector.load %arg9[%c0_71, %c0_72] : memref<8x1xf32, #tpu.memory_space<vmem>>, vector<8x1xf32>
    tpu.vector_store %arg9[%c0_71, %c0_72], %202 {strides = array<i32>} : memref<8x1xf32, #tpu.memory_space<vmem>>, vector<8x1xf32>,
    return
  }
  func.func @transform_0(%arg0: i32) -> (i32, i32, i32) {
    %c0_i32 = arith.constant 0 : i32
    %c0_i32_0 = arith.constant 0 : i32
    %c0_i32_1 = arith.constant 0 : i32
    return %c0_i32, %arg0, %c0_i32_0 : i32, i32, i32
  }
  func.func @transform_1(%arg0: i32) -> (i32, i32) {
    %c0_i32 = arith.constant 0 : i32
    %c0_i32_0 = arith.constant 0 : i32
    %c0_i32_1 = arith.constant 0 : i32
    return %c0_i32, %c0_i32_0 : i32, i32
  }
  func.func @transform_2(%arg0: i32) -> (i32, i32) {
    %c0_i32 = arith.constant 0 : i32
    %c0_i32_0 = arith.constant 0 : i32
    %c0_i32_1 = arith.constant 0 : i32
    return %c0_i32, %c0_i32_0 : i32, i32
  }
  func.func @transform_3(%arg0: i32) -> (i32, i32) {
    %c0_i32 = arith.constant 0 : i32
    %c0_i32_0 = arith.constant 0 : i32
    %c0_i32_1 = arith.constant 0 : i32
    return %c0_i32, %c0_i32_0 : i32, i32
  }
  func.func @transform_4(%arg0: i32) -> (i32, i32) {
    %c0_i32 = arith.constant 0 : i32
    %c0_i32_0 = arith.constant 0 : i32
    %c0_i32_1 = arith.constant 0 : i32
    return %c0_i32, %c0_i32_0 : i32, i32
  }
  func.func @transform_5(%arg0: i32) -> (i32, i32) {
    %c0_i32 = arith.constant 0 : i32
    %c0_i32_0 = arith.constant 0 : i32
    %c0_i32_1 = arith.constant 0 : i32
    return %c0_i32, %c0_i32_0 : i32, i32
  }
  func.func @transform_6(%arg0: i32) -> (i32, i32) {
    %c0_i32 = arith.constant 0 : i32
    %c0_i32_0 = arith.constant 0 : i32
    %c0_i32_1 = arith.constant 0 : i32
    return %c0_i32, %c0_i32_0 : i32, i32
  }
  func.func @transform_7(%arg0: i32) -> (i32, i32) {
    %c0_i32 = arith.constant 0 : i32
    %c0_i32_0 = arith.constant 0 : i32
    %c0_i32_1 = arith.constant 0 : i32
    return %c0_i32, %c0_i32_0 : i32, i32
  }
  func.func @transform_8(%arg0: i32) -> (i32, i32) {
    %c0_i32 = arith.constant 0 : i32
    %c0_i32_0 = arith.constant 0 : i32
    return %arg0, %c0_i32 : i32, i32
  }
}

</mosaic_0001>

<bundles_post_ra>
// kernel: tpu_custom_call.1
= control target key start
LH: loop header
LB: loop body
LE: loop exit
PB: predicated region body
PF: predicated region fallthrough
CT: control target
= control target key end

     0   :  { %s2775_s0 = inlined_call_operand.hbm [shape: bf16[8,8,32], index: 0, kind: input, shape index: {}]   ;;  %s2776_s1 = inlined_call_operand.hbm [shape: bf16[32,512], index: 1, kind: input, shape index: {}]   ;;  %s2777_s2 = inlined_call_operand.hbm [shape: bf16[128,512], index: 2, kind: input, shape index: {}]   ;;  %s2778_s3 = inlined_call_operand.vmem [shape: f32[1,512], index: 3, kind: input, shape index: {}]   ;;  %s2779_s4 = inlined_call_operand.hbm [shape: bf16[128,128], index: 4, kind: input, shape index: {}]   ;;  %s2780_s5 = inlined_call_operand.vmem [shape: f32[1,128], index: 5, kind: input, shape index: {}]   ;;  %s2781_s6 = inlined_call_operand.vmem [shape: f32[1,128], index: 6, kind: input, shape index: {}]   ;;  %s2782_s7 = inlined_call_operand.<no memory space> [shape: f32[1,1], index: 7, kind: input, shape index: {}]   ;;  %s2783_s8 = inlined_call_operand.vmem [shape: f32[8,1], index: 8, kind: output, shape index: {}]  }
   0x1   :  { %v13_v0 = vstv %s2782_s7 }
   0x2   :  { %14 = vst [vmem:[#allocation3] sm:$0x1] %v13_v0 }
   0x3   :  { %15 = vsyncpa [#allocation5], 0 }
   0x4   :  { %16 = vsyncpa [#allocation7], 0 }
   0x5   :  { %17 = vsyncpa [#allocation10], 0  ;;  %s2087_s29 = smov [#allocation6]   ;;  %s1993_s11 = scalar_lea.hbm %s2776_s1, 1024 }
   0x6   :  { %s35_s30 = sshll.u32 %s2087_s29, 4  ;;  %p1994_p0 = scmp.ne.s32.totalorder %s2776_s1, %s1993_s11  ;;  %s36_s30 = int_to_ptr.vmem [resolvable:$true] %s35_s30 }
   0x7   :  { %p1997_p1 = scmp.lt.u32.totalorder %s1993_s11, %s2776_s1 }
   0x9   :  { %p1999_p2 = pnand %p1997_p1, %p1994_p0 }
   0xb   :  { %2002 = shalt.err (!%p1999_p2)
}
   0xc   :  { %s2003_s7 = scalar_lea.vmem %s36_s30, 1024  ;;  %p2008_p4 = scmp.lt.s32.totalorder %s36_s30, %s36_s30 }
   0xd   :  { %p2004_p3 = scmp.ne.s32.totalorder %s36_s30, %s2003_s7  ;;  %p2009_p5 = scmp.lt.s32.totalorder %s2003_s7, %s2003_s7 }
   0xf   :  { %p2010_p6 = por %p2009_p5, %p2008_p4 }
  0x11   :  { %p2011_p7 = pnand %p2010_p6, %p2004_p3 }
  0x13   :  { %2014 = shalt.err (!%p2011_p7)
}
  0x14   :  { %s2088_s16 = smov 256   ;;  %s2089_s17 = smov 16  }
  0x15   :  { %41 = dma.hbm_to_vmem [thread:$0]  %s2776_s1, 1024, %s36_s30, [#allocation7], %s2088_s16, %s2088_s16, %s2089_s17  }
  0x16   :  { %s2090_s20 = smov [#allocation4]   ;;  %s2015_s24 = scalar_lea.hbm %s2775_s0, 512 }
  0x17   :  { %s23_s21 = sshll.u32 %s2090_s20, 4  ;;  %p2016_p8 = scmp.ne.s32.totalorder %s2775_s0, %s2015_s24  ;;  %s24_s21 = int_to_ptr.vmem [resolvable:$true] %s23_s21 }
  0x18   :  { %p2019_p9 = scmp.lt.u32.totalorder %s2015_s24, %s2775_s0 }
  0x1a   :  { %p2021_p10 = pnand %p2019_p9, %p2016_p8 }
  0x1c   :  { %2024 = shalt.err (!%p2021_p10)
}
  0x1d   :  { %s2025_s29 = scalar_lea.vmem %s24_s21, 512  ;;  %p2030_p12 = scmp.lt.s32.totalorder %s24_s21, %s24_s21 }
  0x1e   :  { %p2026_p11 = scmp.ne.s32.totalorder %s24_s21, %s2025_s29  ;;  %p2031_p13 = scmp.lt.s32.totalorder %s2025_s29, %s2025_s29 }
  0x20   :  { %p2032_p0 = por %p2031_p13, %p2030_p12 }
  0x22   :  { %p2033_p1 = pnand %p2032_p0, %p2026_p11 }
  0x24   :  { %2036 = shalt.err (!%p2033_p1)
}
  0x25   :  { %s2091_s1 = smov 64   ;;  %s2092_s30 = smov 4  }
  0x26   :  { %29 = dma.hbm_to_vmem [thread:$0]  %s2775_s0, 512, %s24_s21, [#allocation5], %s2091_s1, %s2091_s1, %s2092_s30  }
  0x27   :  { %s2093_s11 = smov [#allocation8]   ;;  %s2094_s13 = smov [#allocation9]  }
  0x28   :  { %s47_s12 = sshll.u32 %s2093_s11, 4  ;;  %s61_s14 = sshll.u32 %s2094_s13, 4  ;;  %s48_s12 = int_to_ptr.vmem [resolvable:$true] %s47_s12  ;;  %s2176_s14 = int_to_ptr.vmem [resolvable:$true] %s61_s14 }
  0x29   :  { %s2037_s18 = scalar_lea.hbm %s2777_s2, 4096 }
  0x2a   :  { %p2038_p2 = scmp.ne.s32.totalorder %s2777_s2, %s2037_s18  ;;  %p2041_p3 = scmp.lt.u32.totalorder %s2037_s18, %s2777_s2 }
  0x2c   :  { %p2043_p4 = pnand %p2041_p3, %p2038_p2 }
  0x2e   :  { %2046 = shalt.err (!%p2043_p4)
}
  0x2f   :  { %s2047_s0 = scalar_lea.vmem %s48_s12, 4096  ;;  %p2052_p6 = scmp.lt.s32.totalorder %s48_s12, %s48_s12 }
  0x30   :  { %p2048_p5 = scmp.ne.s32.totalorder %s48_s12, %s2047_s0  ;;  %p2053_p7 = scmp.lt.s32.totalorder %s2047_s0, %s2047_s0 }
  0x32   :  { %p2054_p8 = por %p2053_p7, %p2052_p6 }
  0x34   :  { %p2055_p9 = pnand %p2054_p8, %p2048_p5 }
  0x36   :  { %2058 = shalt.err (!%p2055_p9)
}
  0x37   :  { %53 = dma.hbm_to_vmem [thread:$0]  %s2777_s2, 4096, %s48_s12, [#allocation7], %s2088_s16, %s2088_s16, %s2089_s17  }
  0x38   :  { %s2059_s27 = scalar_lea.hbm %s2779_s4, 1024 }
  0x39   :  { %p2060_p10 = scmp.ne.s32.totalorder %s2779_s4, %s2059_s27  ;;  %p2063_p11 = scmp.lt.u32.totalorder %s2059_s27, %s2779_s4 }
  0x3b   :  { %p2065_p12 = pnand %p2063_p11, %p2060_p10 }
  0x3d   :  { %2068 = shalt.err (!%p2065_p12)
}
  0x3e   :  { %s2069_s11 = scalar_lea.vmem %s2176_s14, 1024  ;;  %p2074_p0 = scmp.lt.s32.totalorder %s2176_s14, %s2176_s14 }
  0x3f   :  { %p2070_p13 = scmp.ne.s32.totalorder %s2176_s14, %s2069_s11  ;;  %p2075_p1 = scmp.lt.s32.totalorder %s2069_s11, %s2069_s11 }
  0x41   :  { %p2076_p2 = por %p2075_p1, %p2074_p0 }
  0x43   :  { %p2077_p3 = pnand %p2076_p2, %p2070_p13 }
  0x45   :  { %2080 = shalt.err (!%p2077_p3)
}
  0x46   :  { %67 = dma.hbm_to_vmem [thread:$0]  %s2779_s4, 1024, %s2176_s14, [#allocation10], %s2091_s1, %s2091_s1, %s2092_s30  }
  0x47   :  { %2081 = dma.done.wait [#allocation5], 512  }
  0x48   :  { %2082 = vsyncadd [#allocation5], 4294966784 }
  0x49   :  { %2083 = dma.done.wait [#allocation7], 5120  }
  0x4a   :  { %2084 = vsyncadd [#allocation7], 4294962176 }
  0x4b   :  { %2085 = dma.done.wait [#allocation10], 1024  }
  0x4c   :  { %2086 = vsyncadd [#allocation10], 4294966272  ;;  %v2784_v1 = vmov 0   ;;  %v1761_v2 = vld [vmem:[#allocation6 + $0x4] ss:$16 sps:$4 sm:$0xff]   ;;  %vm185_vm0 = vcmask 261120   ;;  %v105_v46 = vlaneseq }
  0x4d   :  { %230 = vmatprep.mubr.bf16.mxu0 %v2784_v1  ;;  %303 = vmatprep.mubr.bf16.mxu1 %v2784_v1  ;;  %v1763_v3 = vld [vmem:[#allocation6 + $0xc] ss:$16 sps:$4 sm:$0xff]   ;;  %v1765_v4 = vld [vmem:[#allocation6] ss:$16 sps:$4 sm:$0xff]   ;;  %v1766_v5 = vld [vmem:[#allocation6 + $0x8] ss:$16 sps:$4 sm:$0xff]  }
  0x4e   :  { %198 = vmatprep.subr.bf16.mxu0 %v1761_v2  ;;  %271 = vmatprep.subr.bf16.mxu1 %v1763_v3  ;;  %v1767_v6 = vld [vmem:[#allocation6 + $0x24] ss:$16 sps:$4 sm:$0xff]   ;;  %v1769_v7 = vld [vmem:[#allocation6 + $0x2c] ss:$16 sps:$4 sm:$0xff]   ;;  %v1771_v8 = vld [vmem:[#allocation6 + $0x20] ss:$16 sps:$4 sm:$0xff]  }
  0x4f   :  { %199 = vmatpush1.bf16.msra.mxu0 %v1765_v4  ;;  %272 = vmatpush1.bf16.msra.mxu1 %v1766_v5  ;;  %v1772_v9 = vld [vmem:[#allocation6 + $0x28] ss:$16 sps:$4 sm:$0xff]   ;;  %v1773_v10 = vld [vmem:[#allocation4] sm:$0xff]   ;;  %v2217_v12 = vld [vmem:[#allocation8 + $0xc] ss:$16 sps:$4 sm:$0xff]   ;;  %v106_v47 = vshrl.u32 %v105_v46, 7 }
  0x50   :  { %200 = vmatprep.subr.bf16.mxu0 %v1767_v6  ;;  %273 = vmatprep.subr.bf16.mxu1 %v1769_v7  ;;  %v2215_v11 = vld [vmem:[#allocation8 + $0x4] ss:$16 sps:$4 sm:$0xff]   ;;  %v2219_v13 = vld [vmem:[#allocation8] ss:$16 sps:$4 sm:$0xff]   ;;  %v2221_v14 = vld [vmem:[#allocation8 + $0x8] ss:$16 sps:$4 sm:$0xff]  }
  0x51   :  { %v2224_v15 = vld [vmem:[#allocation8 + $0x24] ss:$16 sps:$4 sm:$0xff]   ;;  %v2227_v16 = vld [vmem:[#allocation8 + $0x2c] ss:$16 sps:$4 sm:$0xff]   ;;  %v2231_v17 = vld [vmem:[#allocation8 + $0x20] ss:$16 sps:$4 sm:$0xff]  }
  0x52   :  { %v2235_v18 = vld [vmem:[#allocation8 + $0x28] ss:$16 sps:$4 sm:$0xff]   ;;  %v2239_v19 = vld [vmem:[#allocation8 + $0x44] ss:$16 sps:$4 sm:$0xff]   ;;  %v2243_v21 = vld [vmem:[#allocation8 + $0x4c] ss:$16 sps:$4 sm:$0xff]  }
  0x53   :  { %201 = vmatpush1.bf16.msra.mxu0 %v1771_v8  ;;  %274 = vmatpush1.bf16.msra.mxu1 %v1772_v9  ;;  %v1786_v20 = vld [vmem:[#allocation4 + $0x8] sm:$0xff]   ;;  %v2245_v22 = vld [vmem:[#allocation8 + $0x40] ss:$16 sps:$4 sm:$0xff]   ;;  %v2253_v24 = vld [vmem:[#allocation8 + $0x64] ss:$16 sps:$4 sm:$0xff]   ;;  %v115_v48 = vsub.s32 2, %v106_v47 }
  0x54   :  { %572 = vmatprep.subr.bf16.mxu0 %v2215_v11  ;;  %613 = vmatprep.subr.bf16.mxu1 %v2217_v12  ;;  %v2249_v23 = vld [vmem:[#allocation8 + $0x48] ss:$16 sps:$4 sm:$0xff]   ;;  %v2255_v25 = vld [vmem:[#allocation8 + $0x6c] ss:$16 sps:$4 sm:$0xff]   ;;  %v2259_v26 = vld [vmem:[#allocation8 + $0x60] ss:$16 sps:$4 sm:$0xff]  }
  0x55   :  { %v2263_v27 = vld [vmem:[#allocation8 + $0x68] ss:$16 sps:$4 sm:$0xff]   ;;  %v2267_v28 = vld [vmem:[#allocation8 + $0x84] ss:$16 sps:$4 sm:$0xff]   ;;  %v2269_v29 = vld [vmem:[#allocation8 + $0x8c] ss:$16 sps:$4 sm:$0xff]  }
  0x56   :  { %1646 = vmatmul.mubr.msk.bf16.vlgmr.msra.gmra.mrb[0].mxu0 %vm185_vm0, %v1773_v10  ;;  %1650 = vmatmul.mubr.msk.bf16.vlgmr.msra.gmra.mrb[0].mxu1 %vm185_vm0, %v1773_v10  ;;  %v1799_v30 = vld [vmem:[#allocation4 + $0x10] sm:$0xff]   ;;  %v2275_v32 = vld [vmem:[#allocation8 + $0x88] ss:$16 sps:$4 sm:$0xff]   ;;  %v2283_v34 = vld [vmem:[#allocation8 + $0xac] ss:$16 sps:$4 sm:$0xff]   ;;  %v119_v49 = vsub.s32 3, %v106_v47 }
  0x57   :  { %573 = vmatpush1.bf16.msra.mxu0 %v2219_v13  ;;  %614 = vmatpush1.bf16.msra.mxu1 %v2221_v14  ;;  %v2273_v31 = vld [vmem:[#allocation8 + $0x80] ss:$16 sps:$4 sm:$0xff]   ;;  %v2279_v33 = vld [vmem:[#allocation8 + $0xa4] ss:$16 sps:$4 sm:$0xff]   ;;  %v2289_v36 = vld [vmem:[#allocation8 + $0xa8] ss:$16 sps:$4 sm:$0xff]  }
  0x58   :  { %574 = vmatprep.subr.bf16.mxu0 %v2224_v15  ;;  %615 = vmatprep.subr.bf16.mxu1 %v2227_v16  ;;  %v2287_v35 = vld [vmem:[#allocation8 + $0xa0] ss:$16 sps:$4 sm:$0xff]   ;;  %v2293_v37 = vld [vmem:[#allocation8 + $0xc4] ss:$16 sps:$4 sm:$0xff]   ;;  %v2297_v38 = vld [vmem:[#allocation8 + $0xcc] ss:$16 sps:$4 sm:$0xff]  }
  0x59   :  { %240 = vmatprep.mubr.bf16.mxu0 %v2784_v1  ;;  %313 = vmatprep.mubr.bf16.mxu1 %v2784_v1  ;;  %v1812_v39 = vld [vmem:[#allocation4 + $0x18] sm:$0xff]   ;;  %v2301_v40 = vld [vmem:[#allocation8 + $0xc0] ss:$16 sps:$4 sm:$0xff]   ;;  %v2305_v42 = vld [vmem:[#allocation8 + $0xe4] ss:$16 sps:$4 sm:$0xff]   ;;  %v107_v50 = vsub.s32 0, %v106_v47 }
  0x5a   :  { %v2303_v41 = vld [vmem:[#allocation8 + $0xc8] ss:$16 sps:$4 sm:$0xff]   ;;  %v2307_v43 = vld [vmem:[#allocation8 + $0xec] ss:$16 sps:$4 sm:$0xff]   ;;  %v2317_v44 = vld [vmem:[#allocation8 + $0xe0] ss:$16 sps:$4 sm:$0xff]  }
  0x5b   :  { %575 = vmatpush1.bf16.msra.mxu0 %v2231_v17  ;;  %616 = vmatpush1.bf16.msra.mxu1 %v2235_v18  ;;  %v2319_v45 = vld [vmem:[#allocation8 + $0xe8] ss:$16 sps:$4 sm:$0xff]   ;;  %v103_v51 = vld [vmem:[%s2778_s3] sm:$0xf]  ;;  %v111_v52 = vsub.s32 1, %v106_v47  ;;  %vm2097_vm1 = vmmov 0  }
  0x5c   :  { %576 = vmatprep.subr.bf16.mxu0 %v2239_v19  ;;  %617 = vmatprep.subr.bf16.mxu1 %v2243_v21  ;;  %v2368_v53 = vrot.slane %v103_v51, %v115_v48  ;;  %v2374_v56 = vrot.slane %v103_v51, %v119_v49  ;;  %v108_v57 = vrot.slane %v103_v51, %v107_v50  ;;  %vm1625_vm2 = vcmask 7168  }
  0x5d   :  { %v112_v60 = vrot.slane %v103_v51, %v111_v52 }
  0x5e   :  { %1647 = vmatmul.mubr.msk.bf16.gmra.mrb[4].mxu0 %vm185_vm0, %v1786_v20  ;;  %1651 = vmatmul.mubr.msk.bf16.gmra.mrb[4].mxu1 %vm185_vm0, %v1786_v20 }
  0x5f   :  { %577 = vmatpush1.bf16.msra.mxu0 %v2245_v22  ;;  %618 = vmatpush1.bf16.msra.mxu1 %v2249_v23 }
  0x60   :  { %578 = vmatprep.subr.bf16.mxu0 %v2253_v24  ;;  %619 = vmatprep.subr.bf16.mxu1 %v2255_v25 }
  0x61   :  { %250 = vmatprep.mubr.bf16.mxu0 %v2784_v1  ;;  %323 = vmatprep.mubr.bf16.mxu1 %v2784_v1 }
  0x63   :  { %579 = vmatpush1.bf16.msra.mxu0 %v2259_v26  ;;  %620 = vmatpush1.bf16.msra.mxu1 %v2263_v27 }
  0x64   :  { %580 = vmatprep.subr.bf16.mxu0 %v2267_v28  ;;  %621 = vmatprep.subr.bf16.mxu1 %v2269_v29 }
  0x66   :  { %1648 = vmatmul.mubr.msk.bf16.gmra.mrb[8].mxu0 %vm185_vm0, %v1799_v30  ;;  %1652 = vmatmul.mubr.msk.bf16.gmra.mrb[8].mxu1 %vm185_vm0, %v1799_v30 }
  0x67   :  { %581 = vmatpush1.bf16.msra.mxu0 %v2273_v31  ;;  %622 = vmatpush1.bf16.msra.mxu1 %v2275_v32 }
  0x68   :  { %582 = vmatprep.subr.bf16.mxu0 %v2279_v33  ;;  %623 = vmatprep.subr.bf16.mxu1 %v2283_v34 }
  0x69   :  { %260 = vmatprep.mubr.bf16.mxu0 %v2784_v1  ;;  %333 = vmatprep.mubr.bf16.mxu1 %v2784_v1 }
  0x6b   :  { %583 = vmatpush1.bf16.msra.mxu0 %v2287_v35  ;;  %624 = vmatpush1.bf16.msra.mxu1 %v2289_v36 }
  0x6c   :  { %584 = vmatprep.subr.bf16.mxu0 %v2293_v37  ;;  %625 = vmatprep.subr.bf16.mxu1 %v2297_v38 }
  0x6e   :  { %1649 = vmatmul.mubr.msk.bf16.gmra.mrb[12].mxu0 %vm185_vm0, %v1812_v39  ;;  %1653 = vmatmul.mubr.msk.bf16.gmra.mrb[12].mxu1 %vm185_vm0, %v1812_v39 }
  0x6f   :  { %585 = vmatpush1.bf16.msra.mxu0 %v2301_v40  ;;  %626 = vmatpush1.bf16.msra.mxu1 %v2303_v41 }
  0x70   :  { %586 = vmatprep.subr.bf16.mxu0 %v2305_v42  ;;  %627 = vmatprep.subr.bf16.mxu1 %v2307_v43 }
  0x71   :  { %604 = vmatprep.mubr.bf16.mxu0 %v2784_v1  ;;  %645 = vmatprep.mubr.bf16.mxu1 %v2784_v1 }
  0x73   :  { %587 = vmatpush1.bf16.msra.mxu0 %v2317_v44  ;;  %628 = vmatpush1.bf16.msra.mxu1 %v2319_v45 }
  0x74   :  { %688 = vmatprep.subr.bf16.mxu0 %v2215_v11  ;;  %729 = vmatprep.subr.bf16.mxu1 %v2217_v12 }
  0x76   :  { %605 = vmatmul.mubr.bf16.vlgmr.msra.gmra.mrb[16].mxu0 %v2784_v1  ;;  %646 = vmatmul.mubr.bf16.vlgmr.msra.gmra.mrb[16].mxu1 %v2784_v1 }
  0x77   :  { %689 = vmatpush1.bf16.msra.mxu0 %v2219_v13  ;;  %730 = vmatpush1.bf16.msra.mxu1 %v2221_v14 }
  0x78   :  { %690 = vmatprep.subr.bf16.mxu0 %v2224_v15  ;;  %731 = vmatprep.subr.bf16.mxu1 %v2227_v16 }
  0x79   :  { %720 = vmatprep.mubr.bf16.mxu0 %v2784_v1  ;;  %761 = vmatprep.mubr.bf16.mxu1 %v2784_v1 }
  0x7b   :  { %691 = vmatpush1.bf16.msra.mxu0 %v2231_v17  ;;  %732 = vmatpush1.bf16.msra.mxu1 %v2235_v18 }
  0x7c   :  { %692 = vmatprep.subr.bf16.mxu0 %v2239_v19  ;;  %733 = vmatprep.subr.bf16.mxu1 %v2243_v21 }
  0x7f   :  { %693 = vmatpush1.bf16.msra.mxu0 %v2245_v22  ;;  %734 = vmatpush1.bf16.msra.mxu1 %v2249_v23 }
  0x80   :  { %694 = vmatprep.subr.bf16.mxu0 %v2253_v24  ;;  %735 = vmatprep.subr.bf16.mxu1 %v2255_v25 }
  0x83   :  { %695 = vmatpush1.bf16.msra.mxu0 %v2259_v26  ;;  %736 = vmatpush1.bf16.msra.mxu1 %v2263_v27 }
  0x84   :  { %696 = vmatprep.subr.bf16.mxu0 %v2267_v28  ;;  %737 = vmatprep.subr.bf16.mxu1 %v2269_v29 }
  0x87   :  { %697 = vmatpush1.bf16.msra.mxu0 %v2273_v31  ;;  %738 = vmatpush1.bf16.msra.mxu1 %v2275_v32 }
  0x88   :  { %698 = vmatprep.subr.bf16.mxu0 %v2279_v33  ;;  %739 = vmatprep.subr.bf16.mxu1 %v2283_v34 }
  0x8b   :  { %699 = vmatpush1.bf16.msra.mxu0 %v2287_v35  ;;  %740 = vmatpush1.bf16.msra.mxu1 %v2289_v36 }
  0x8c   :  { %700 = vmatprep.subr.bf16.mxu0 %v2293_v37  ;;  %741 = vmatprep.subr.bf16.mxu1 %v2297_v38 }
  0x8f   :  { %701 = vmatpush1.bf16.msra.mxu0 %v2301_v40  ;;  %742 = vmatpush1.bf16.msra.mxu1 %v2303_v41 }
  0x90   :  { %702 = vmatprep.subr.bf16.mxu0 %v2305_v42  ;;  %743 = vmatprep.subr.bf16.mxu1 %v2307_v43 }
  0x93   :  { %703 = vmatpush1.bf16.msra.mxu0 %v2317_v44  ;;  %744 = vmatpush1.bf16.msra.mxu1 %v2319_v45 }
  0x94   :  { %804 = vmatprep.subr.bf16.mxu0 %v2215_v11  ;;  %845 = vmatprep.subr.bf16.mxu1 %v2217_v12 }
 0x129   :  { %v2370_v54 = vpop.f32.mrb[0].mxu0  ;;  %v2372_v55 = vpop.f32.mrb[0].mxu1 }
 0x12a   :  { %v234_v58 = vpop.f32.mrb[1].mxu0  ;;  %v307_v59 = vpop.f32.mrb[1].mxu1 }
 0x12b   :  { %v236_v61 = vpop.f32.mrb[2].mxu0  ;;  %v309_v62 = vpop.f32.mrb[2].mxu1 }
 0x12c   :  { %v2376_v63 = vadd.f32 %v236_v61, %v108_v57  ;;  %v238_v0 = vpop.f32.mrb[3].mxu0  ;;  %v2379_v2 = vadd.f32 %v309_v62, %v2368_v53  ;;  %v311_v3 = vpop.f32.mrb[3].mxu1 }
 0x12d   :  { %v2381_v4 = vadd.f32 %v238_v0, %v112_v60  ;;  %v2384_v5 = vadd.f32 %v311_v3, %v2374_v56 }
 0x131   :  { %v242_v6 = vpop.f32.mrb[4].mxu0  ;;  %v315_v7 = vpop.f32.mrb[4].mxu1 }
 0x132   :  { %v2386_v8 = vadd.f32 %v242_v6, %v108_v57  ;;  %v244_v9 = vpop.f32.mrb[5].mxu0  ;;  %v2389_v10 = vadd.f32 %v315_v7, %v2368_v53  ;;  %v317_v20 = vpop.f32.mrb[5].mxu1 }
 0x133   :  { %v2391_v30 = vadd.f32 %v244_v9, %v112_v60  ;;  %v246_v39 = vpop.f32.mrb[6].mxu0  ;;  %v2394_v46 = vadd.f32 %v317_v20, %v2374_v56  ;;  %v319_v47 = vpop.f32.mrb[6].mxu1 }
 0x134   :  { %v2396_v48 = vadd.f32 %v246_v39, %v108_v57  ;;  %v248_v49 = vpop.f32.mrb[7].mxu0  ;;  %v2399_v50 = vadd.f32 %v319_v47, %v2368_v53  ;;  %v321_v51 = vpop.f32.mrb[7].mxu1 }
 0x135   :  { %2786 = vst [vmem:[#allocation14_spill] sm:$0xff] %v2394_v46  ;;  %v2401_v52 = vadd.f32 %v248_v49, %v112_v60  ;;  %v2404_v61 = vadd.f32 %v321_v51, %v2374_v56 }
 0x136   :  { %2787 = vst [vmem:[#allocation15_spill] sm:$0xff] %v2396_v48  ;;  %2788 = vst [vmem:[#allocation16_spill] sm:$0xff] %v2399_v50 }
 0x137   :  { %2789 = vst [vmem:[#allocation17_spill] sm:$0xff] %v2401_v52  ;;  %2790 = vst [vmem:[#allocation18_spill] sm:$0xff] %v2404_v61 }
 0x139   :  { %v252_v62 = vpop.f32.mrb[8].mxu0  ;;  %v325_v0 = vpop.f32.mrb[8].mxu1 }
 0x13a   :  { %v2406_v3 = vadd.f32 %v252_v62, %v108_v57  ;;  %v254_v6 = vpop.f32.mrb[9].mxu0  ;;  %v2409_v7 = vadd.f32 %v325_v0, %v2368_v53  ;;  %v327_v9 = vpop.f32.mrb[9].mxu1 }
 0x13b   :  { %v2411_v20 = vadd.f32 %v254_v6, %v112_v60  ;;  %v256_v39 = vpop.f32.mrb[10].mxu0  ;;  %v2414_v47 = vadd.f32 %v327_v9, %v2374_v56  ;;  %v329_v49 = vpop.f32.mrb[10].mxu1 }
 0x13c   :  { %2791 = vst [vmem:[#allocation19_spill] sm:$0xff] %v2406_v3  ;;  %2792 = vst [vmem:[#allocation20_spill] sm:$0xff] %v2409_v7  ;;  %v2416_v1 = vadd.f32 %v256_v39, %v108_v57  ;;  %v258_v51 = vpop.f32.mrb[11].mxu0  ;;  %v2419_v61 = vadd.f32 %v329_v49, %v2368_v53  ;;  %v331_v62 = vpop.f32.mrb[11].mxu1 }
 0x13d   :  { %2793 = vst [vmem:[#allocation21_spill] sm:$0xff] %v2411_v20  ;;  %2794 = vst [vmem:[#allocation22_spill] sm:$0xff] %v2414_v47  ;;  %v2421_v3 = vadd.f32 %v258_v51, %v112_v60  ;;  %v2424_v0 = vadd.f32 %v331_v62, %v2374_v56 }
 0x13e   :  { %2795 = vst [vmem:[#allocation23_spill] sm:$0xff] %v2416_v1  ;;  %2796 = vst [vmem:[#allocation24_spill] sm:$0xff] %v2419_v61 }
 0x13f   :  { %2797 = vst [vmem:[#allocation25_spill] sm:$0xff] %v2421_v3  ;;  %2798 = vst [vmem:[#allocation26_spill] sm:$0xff] %v2424_v0 }
 0x141   :  { %v262_v7 = vpop.f32.mrb[12].mxu0  ;;  %v335_v6 = vpop.f32.mrb[12].mxu1 }
 0x142   :  { %v2426_v20 = vadd.f32 %v262_v7, %v108_v57  ;;  %v264_v52 = vpop.f32.mrb[13].mxu0  ;;  %v2429_v9 = vadd.f32 %v335_v6, %v2368_v53  ;;  %v337_v39 = vpop.f32.mrb[13].mxu1 }
 0x143   :  { %v2431_v1 = vadd.f32 %v264_v52, %v112_v60  ;;  %v266_v47 = vpop.f32.mrb[14].mxu0  ;;  %v2434_v49 = vadd.f32 %v337_v39, %v2374_v56  ;;  %v339_v51 = vpop.f32.mrb[14].mxu1  ;;  %v233_v52 = vadd.f32 %v2370_v54, %v108_v57  ;;  %v235_v39 = vadd.f32 %v234_v58, %v112_v60 }
 0x144   :  { %2799 = vst [vmem:[#allocation27_spill] sm:$0xff] %v2426_v20  ;;  %2800 = vst [vmem:[#allocation28_spill] sm:$0xff] %v2429_v9  ;;  %v2436_v3 = vadd.f32 %v266_v47, %v108_v57  ;;  %v268_v62 = vpop.f32.mrb[15].mxu0  ;;  %v2439_v0 = vadd.f32 %v339_v51, %v2368_v53  ;;  %v341_v7 = vpop.f32.mrb[15].mxu1 }
 0x145   :  { %2801 = vst [vmem:[#allocation29_spill] sm:$0xff] %v2431_v1  ;;  %2802 = vst [vmem:[#allocation30_spill] sm:$0xff] %v2434_v49  ;;  %v2441_v20 = vadd.f32 %v268_v62, %v112_v60  ;;  %v2444_v6 = vadd.f32 %v341_v7, %v2374_v56  ;;  %v306_v1 = vadd.f32 %v2372_v55, %v2368_v53 }
 0x146   :  { %2803 = vst [vmem:[#allocation31_spill] sm:$0xff] %v2436_v3  ;;  %2804 = vst [vmem:[#allocation32_spill] sm:$0xff] %v2439_v0  ;;  %v308_v49 = vadd.f32 %v307_v59, %v2374_v56 }
 0x147   :  { %2805 = vst [vmem:[#allocation33_spill] sm:$0xff] %v2441_v20  ;;  %2806 = vst [vmem:[#allocation34_spill] sm:$0xff] %v2444_v6 }
 0x149   :  { %v606_v47 = vpop.f32.mrb[16].mxu0  ;;  %v647_v3 = vpop.f32.mrb[16].mxu1 }
 0x14a   :  { %v654_v9 = vadd.f32 %v606_v47, %v233_v52  ;;  %v656_v61 = vadd.f32 %v647_v3, %v306_v1  ;;  %v608_v51 = vpop.f32.mrb[17].mxu0  ;;  %v649_v0 = vpop.f32.mrb[17].mxu1 }
 0x14b   :  { %v655_v50 = vadd.f32 %v608_v51, %v235_v39  ;;  %v657_v62 = vadd.f32 %v649_v0, %v308_v49  ;;  %v610_v20 = vpop.f32.mrb[18].mxu0  ;;  %v651_v48 = vpop.f32.mrb[18].mxu1 }
 0x14c   :  { %v1686_v7 = vmul.f32 -1.442695, %v654_v9  ;;  %v611_v6 = vpop.f32.mrb[19].mxu0  ;;  %v652_v46 = vpop.f32.mrb[19].mxu1  ;;  %v1688_v53 = vmul.f32 -1.442695, %v656_v61 }
 0x14d   :  { %v1687_v54 = vmul.f32 -1.442695, %v655_v50  ;;  %v2807_v6 = vmov 0  }
 0x14e   :  { %1833 = vpow2.f32 %v1686_v7 }
 0x14f   :  { %1835 = vpow2.f32 %v1687_v54 }
 0x150   :  { %1837 = vtanh.f32 %v657_v62 }
 0x151   :  { %1839 = vpow2.f32 %v1688_v53 }
 0x158   :  { %v1834_v55 = vpop.eup %1833 }
 0x159   :  { %v667_v57 = vadd.f32 1.0, %v1834_v55  ;;  %v1836_v56 = vpop.eup %1835 }
 0x15a   :  { %v668_v1 = vadd.f32 1.0, %v1836_v56  ;;  %v1838_v58 = vpop.eup %1837 }
 0x15b   :  { %1841 = vrcp.f32 %v667_v57  ;;  %v1840_v59 = vpop.eup %1839 }
 0x15c   :  { %1843 = vrcp.f32 %v668_v1  ;;  %v669_v20 = vadd.f32 1.0, %v1840_v59 }
 0x15e   :  { %1845 = vrcp.f32 %v669_v20 }
 0x165   :  { %v1842_v60 = vpop.eup %1841 }
 0x166   :  { %v678_v3 = vmul.f32 %v1842_v60, %v1838_v58  ;;  %v1844_v48 = vpop.eup %1843 }
 0x167   :  { %v677_v0 = vmul.f32 0.0, %v1844_v48 }
 0x168   :  { %v1846_v50 = vpop.eup %1845 }
 0x169   :  { %v2450_v46 = vadd.f32 %v678_v3, %v677_v0 }
 0x16b   :  { %1847 = vtanh.f32 %v2450_v46 }
 0x175   :  { %v1848_v61 = vpop.eup %1847 }
 0x176   :  { %v681_v9 = vmul.f32 %v1848_v61, %v1846_v50 }
 0x178   :  { %v687_v49 = vpack.c.bf16 %v681_v9, %v681_v9 }
 0x17a   :  { %721 = vmatmul.mubr.bf16.vlgmr.msra.gmra.mrb[20].mxu0 %v687_v49  ;;  %762 = vmatmul.mubr.bf16.vlgmr.msra.gmra.mrb[20].mxu1 %v687_v49 }
 0x17b   :  { %805 = vmatpush1.bf16.msra.mxu0 %v2219_v13  ;;  %846 = vmatpush1.bf16.msra.mxu1 %v2221_v14 }
 0x17c   :  { %806 = vmatprep.subr.bf16.mxu0 %v2224_v15  ;;  %847 = vmatprep.subr.bf16.mxu1 %v2227_v16 }
 0x17d   :  { %836 = vmatprep.mubr.bf16.mxu0 %v2807_v6  ;;  %877 = vmatprep.mubr.bf16.mxu1 %v2807_v6 }
 0x17f   :  { %807 = vmatpush1.bf16.msra.mxu0 %v2231_v17  ;;  %848 = vmatpush1.bf16.msra.mxu1 %v2235_v18 }
 0x180   :  { %808 = vmatprep.subr.bf16.mxu0 %v2239_v19  ;;  %849 = vmatprep.subr.bf16.mxu1 %v2243_v21 }
 0x183   :  { %809 = vmatpush1.bf16.msra.mxu0 %v2245_v22  ;;  %850 = vmatpush1.bf16.msra.mxu1 %v2249_v23 }
 0x184   :  { %810 = vmatprep.subr.bf16.mxu0 %v2253_v24  ;;  %851 = vmatprep.subr.bf16.mxu1 %v2255_v25 }
 0x187   :  { %811 = vmatpush1.bf16.msra.mxu0 %v2259_v26  ;;  %852 = vmatpush1.bf16.msra.mxu1 %v2263_v27 }
 0x188   :  { %812 = vmatprep.subr.bf16.mxu0 %v2267_v28  ;;  %853 = vmatprep.subr.bf16.mxu1 %v2269_v29 }
 0x18b   :  { %813 = vmatpush1.bf16.msra.mxu0 %v2273_v31  ;;  %854 = vmatpush1.bf16.msra.mxu1 %v2275_v32 }
 0x18c   :  { %814 = vmatprep.subr.bf16.mxu0 %v2279_v33  ;;  %855 = vmatprep.subr.bf16.mxu1 %v2283_v34 }
 0x18f   :  { %815 = vmatpush1.bf16.msra.mxu0 %v2287_v35  ;;  %856 = vmatpush1.bf16.msra.mxu1 %v2289_v36 }
 0x190   :  { %816 = vmatprep.subr.bf16.mxu0 %v2293_v37  ;;  %857 = vmatprep.subr.bf16.mxu1 %v2297_v38 }
 0x193   :  { %817 = vmatpush1.bf16.msra.mxu0 %v2301_v40  ;;  %858 = vmatpush1.bf16.msra.mxu1 %v2303_v41 }
 0x194   :  { %818 = vmatprep.subr.bf16.mxu0 %v2305_v42  ;;  %859 = vmatprep.subr.bf16.mxu1 %v2307_v43 }
 0x197   :  { %819 = vmatpush1.bf16.msra.mxu0 %v2317_v44  ;;  %860 = vmatpush1.bf16.msra.mxu1 %v2319_v45 }
 0x198   :  { %920 = vmatprep.subr.bf16.mxu0 %v2215_v11  ;;  %961 = vmatprep.subr.bf16.mxu1 %v2217_v12 }
 0x24d   :  { %v722_v52 = vpop.f32.mrb[20].mxu0  ;;  %v763_v39 = vpop.f32.mrb[20].mxu1 }
 0x24e   :  { %v770_v47 = vadd.f32 %v722_v52, %v2376_v63  ;;  %v772_v51 = vadd.f32 %v763_v39, %v2379_v2  ;;  %v724_v62 = vpop.f32.mrb[21].mxu0  ;;  %v765_v7 = vpop.f32.mrb[21].mxu1 }
 0x24f   :  { %v771_v54 = vadd.f32 %v724_v62, %v2381_v4  ;;  %v773_v53 = vadd.f32 %v765_v7, %v2384_v5  ;;  %v726_v55 = vpop.f32.mrb[22].mxu0  ;;  %v767_v57 = vpop.f32.mrb[22].mxu1 }
 0x250   :  { %v1689_v56 = vmul.f32 -1.442695, %v770_v47  ;;  %v727_v1 = vpop.f32.mrb[23].mxu0  ;;  %v768_v58 = vpop.f32.mrb[23].mxu1  ;;  %v1691_v60 = vmul.f32 -1.442695, %v772_v51 }
 0x251   :  { %v1690_v59 = vmul.f32 -1.442695, %v771_v54 }
 0x252   :  { %1849 = vpow2.f32 %v1689_v56  ;;  %v2808_v56 = vld [vmem:[#allocation14_spill] sm:$0xff] }
 0x253   :  { %1851 = vpow2.f32 %v1690_v59 }
 0x254   :  { %1853 = vtanh.f32 %v773_v53 }
 0x255   :  { %1855 = vpow2.f32 %v1691_v60 }
 0x25c   :  { %v1850_v3 = vpop.eup %1849 }
 0x25d   :  { %v783_v48 = vadd.f32 1.0, %v1850_v3  ;;  %v1852_v63 = vpop.eup %1851 }
 0x25e   :  { %v784_v2 = vadd.f32 1.0, %v1852_v63  ;;  %v1854_v4 = vpop.eup %1853 }
 0x25f   :  { %1857 = vrcp.f32 %v783_v48  ;;  %v1856_v20 = vpop.eup %1855 }
 0x260   :  { %1859 = vrcp.f32 %v784_v2  ;;  %v785_v61 = vadd.f32 1.0, %v1856_v20 }
 0x262   :  { %1861 = vrcp.f32 %v785_v61 }
 0x269   :  { %v1858_v5 = vpop.eup %1857 }
 0x26a   :  { %v794_v0 = vmul.f32 %v1858_v5, %v1854_v4  ;;  %v1860_v50 = vpop.eup %1859 }
 0x26b   :  { %v793_v9 = vmul.f32 %v1860_v50, %v2450_v46 }
 0x26c   :  { %v1862_v52 = vpop.eup %1861 }
 0x26d   :  { %v2492_v49 = vadd.f32 %v794_v0, %v793_v9 }
 0x26f   :  { %1863 = vtanh.f32 %v2492_v49 }
 0x279   :  { %v1864_v39 = vpop.eup %1863 }
 0x27a   :  { %v797_v47 = vmul.f32 %v1864_v39, %v1862_v52 }
 0x27c   :  { %v803_v51 = vpack.c.bf16 %v797_v47, %v797_v47 }
 0x27e   :  { %837 = vmatmul.mubr.bf16.vlgmr.msra.gmra.mrb[24].mxu0 %v803_v51  ;;  %878 = vmatmul.mubr.bf16.vlgmr.msra.gmra.mrb[24].mxu1 %v803_v51 }
 0x27f   :  { %921 = vmatpush1.bf16.msra.mxu0 %v2219_v13  ;;  %962 = vmatpush1.bf16.msra.mxu1 %v2221_v14 }
 0x280   :  { %922 = vmatprep.subr.bf16.mxu0 %v2224_v15  ;;  %963 = vmatprep.subr.bf16.mxu1 %v2227_v16 }
 0x281   :  { %952 = vmatprep.mubr.bf16.mxu0 %v2807_v6  ;;  %993 = vmatprep.mubr.bf16.mxu1 %v2807_v6 }
 0x283   :  { %923 = vmatpush1.bf16.msra.mxu0 %v2231_v17  ;;  %964 = vmatpush1.bf16.msra.mxu1 %v2235_v18 }
 0x284   :  { %924 = vmatprep.subr.bf16.mxu0 %v2239_v19  ;;  %965 = vmatprep.subr.bf16.mxu1 %v2243_v21 }
 0x287   :  { %925 = vmatpush1.bf16.msra.mxu0 %v2245_v22  ;;  %966 = vmatpush1.bf16.msra.mxu1 %v2249_v23 }
 0x288   :  { %926 = vmatprep.subr.bf16.mxu0 %v2253_v24  ;;  %967 = vmatprep.subr.bf16.mxu1 %v2255_v25 }
 0x28b   :  { %927 = vmatpush1.bf16.msra.mxu0 %v2259_v26  ;;  %968 = vmatpush1.bf16.msra.mxu1 %v2263_v27 }
 0x28c   :  { %928 = vmatprep.subr.bf16.mxu0 %v2267_v28  ;;  %969 = vmatprep.subr.bf16.mxu1 %v2269_v29 }
 0x28f   :  { %929 = vmatpush1.bf16.msra.mxu0 %v2273_v31  ;;  %970 = vmatpush1.bf16.msra.mxu1 %v2275_v32 }
 0x290   :  { %930 = vmatprep.subr.bf16.mxu0 %v2279_v33  ;;  %971 = vmatprep.subr.bf16.mxu1 %v2283_v34 }
 0x293   :  { %931 = vmatpush1.bf16.msra.mxu0 %v2287_v35  ;;  %972 = vmatpush1.bf16.msra.mxu1 %v2289_v36 }
 0x294   :  { %932 = vmatprep.subr.bf16.mxu0 %v2293_v37  ;;  %973 = vmatprep.subr.bf16.mxu1 %v2297_v38 }
 0x297   :  { %933 = vmatpush1.bf16.msra.mxu0 %v2301_v40  ;;  %974 = vmatpush1.bf16.msra.mxu1 %v2303_v41 }
 0x298   :  { %934 = vmatprep.subr.bf16.mxu0 %v2305_v42  ;;  %975 = vmatprep.subr.bf16.mxu1 %v2307_v43 }
 0x29b   :  { %935 = vmatpush1.bf16.msra.mxu0 %v2317_v44  ;;  %976 = vmatpush1.bf16.msra.mxu1 %v2319_v45 }
 0x29c   :  { %1036 = vmatprep.subr.bf16.mxu0 %v2215_v11  ;;  %1077 = vmatprep.subr.bf16.mxu1 %v2217_v12 }
 0x351   :  { %v838_v46 = vpop.f32.mrb[24].mxu0  ;;  %v879_v62 = vpop.f32.mrb[24].mxu1 }
 0x352   :  { %v886_v7 = vadd.f32 %v838_v46, %v2386_v8  ;;  %v888_v54 = vadd.f32 %v879_v62, %v2389_v10  ;;  %v840_v53 = vpop.f32.mrb[25].mxu0  ;;  %v881_v55 = vpop.f32.mrb[25].mxu1 }
 0x353   :  { %v887_v57 = vadd.f32 %v840_v53, %v2391_v30  ;;  %v889_v1 = vadd.f32 %v881_v55, %v2808_v56  ;;  %v842_v58 = vpop.f32.mrb[26].mxu0  ;;  %v883_v59 = vpop.f32.mrb[26].mxu1  ;;  %v2810_v55 = vld [vmem:[#allocation16_spill] sm:$0xff] }
 0x354   :  { %v1692_v60 = vmul.f32 -1.442695, %v886_v7  ;;  %v843_v3 = vpop.f32.mrb[27].mxu0  ;;  %v884_v48 = vpop.f32.mrb[27].mxu1  ;;  %v1694_v2 = vmul.f32 -1.442695, %v888_v54 }
 0x355   :  { %v1693_v63 = vmul.f32 -1.442695, %v887_v57  ;;  %v2809_v54 = vld [vmem:[#allocation15_spill] sm:$0xff]  ;;  %v2811_v58 = vld [vmem:[#allocation17_spill] sm:$0xff] }
 0x356   :  { %1865 = vpow2.f32 %v1692_v60  ;;  %v2812_v60 = vld [vmem:[#allocation18_spill] sm:$0xff] }
 0x357   :  { %1867 = vpow2.f32 %v1693_v63 }
 0x358   :  { %1869 = vtanh.f32 %v889_v1 }
 0x359   :  { %1871 = vpow2.f32 %v1694_v2 }
 0x360   :  { %v1866_v4 = vpop.eup %1865 }
 0x361   :  { %v899_v20 = vadd.f32 1.0, %v1866_v4  ;;  %v1868_v8 = vpop.eup %1867 }
 0x362   :  { %v900_v10 = vadd.f32 1.0, %v1868_v8  ;;  %v1870_v30 = vpop.eup %1869 }
 0x363   :  { %1873 = vrcp.f32 %v899_v20  ;;  %v1872_v5 = vpop.eup %1871 }
 0x364   :  { %1875 = vrcp.f32 %v900_v10  ;;  %v901_v9 = vadd.f32 1.0, %v1872_v5 }
 0x366   :  { %1877 = vrcp.f32 %v901_v9 }
 0x36d   :  { %v1874_v0 = vpop.eup %1873 }
 0x36e   :  { %v910_v50 = vmul.f32 %v1874_v0, %v1870_v30  ;;  %v1876_v61 = vpop.eup %1875 }
 0x36f   :  { %v909_v52 = vmul.f32 %v1876_v61, %v2492_v49 }
 0x370   :  { %v1878_v47 = vpop.eup %1877 }
 0x371   :  { %v2534_v39 = vadd.f32 %v910_v50, %v909_v52 }
 0x373   :  { %1879 = vtanh.f32 %v2534_v39 }
 0x37d   :  { %v1880_v51 = vpop.eup %1879 }
 0x37e   :  { %v913_v46 = vmul.f32 %v1880_v51, %v1878_v47 }
 0x380   :  { %v919_v62 = vpack.c.bf16 %v913_v46, %v913_v46 }
 0x382   :  { %953 = vmatmul.mubr.bf16.vlgmr.msra.gmra.mrb[28].mxu0 %v919_v62  ;;  %994 = vmatmul.mubr.bf16.vlgmr.msra.gmra.mrb[28].mxu1 %v919_v62 }
 0x383   :  { %1037 = vmatpush1.bf16.msra.mxu0 %v2219_v13  ;;  %1078 = vmatpush1.bf16.msra.mxu1 %v2221_v14 }
 0x384   :  { %1038 = vmatprep.subr.bf16.mxu0 %v2224_v15  ;;  %1079 = vmatprep.subr.bf16.mxu1 %v2227_v16 }
 0x385   :  { %1068 = vmatprep.mubr.bf16.mxu0 %v2807_v6  ;;  %1109 = vmatprep.mubr.bf16.mxu1 %v2807_v6 }
 0x387   :  { %1039 = vmatpush1.bf16.msra.mxu0 %v2231_v17  ;;  %1080 = vmatpush1.bf16.msra.mxu1 %v2235_v18 }
 0x388   :  { %1040 = vmatprep.subr.bf16.mxu0 %v2239_v19  ;;  %1081 = vmatprep.subr.bf16.mxu1 %v2243_v21 }
 0x38b   :  { %1041 = vmatpush1.bf16.msra.mxu0 %v2245_v22  ;;  %1082 = vmatpush1.bf16.msra.mxu1 %v2249_v23 }
 0x38c   :  { %1042 = vmatprep.subr.bf16.mxu0 %v2253_v24  ;;  %1083 = vmatprep.subr.bf16.mxu1 %v2255_v25 }
 0x38f   :  { %1043 = vmatpush1.bf16.msra.mxu0 %v2259_v26  ;;  %1084 = vmatpush1.bf16.msra.mxu1 %v2263_v27 }
 0x390   :  { %1044 = vmatprep.subr.bf16.mxu0 %v2267_v28  ;;  %1085 = vmatprep.subr.bf16.mxu1 %v2269_v29 }
 0x393   :  { %1045 = vmatpush1.bf16.msra.mxu0 %v2273_v31  ;;  %1086 = vmatpush1.bf16.msra.mxu1 %v2275_v32 }
 0x394   :  { %1046 = vmatprep.subr.bf16.mxu0 %v2279_v33  ;;  %1087 = vmatprep.subr.bf16.mxu1 %v2283_v34 }
 0x397   :  { %1047 = vmatpush1.bf16.msra.mxu0 %v2287_v35  ;;  %1088 = vmatpush1.bf16.msra.mxu1 %v2289_v36 }
 0x398   :  { %1048 = vmatprep.subr.bf16.mxu0 %v2293_v37  ;;  %1089 = vmatprep.subr.bf16.mxu1 %v2297_v38 }
 0x39b   :  { %1049 = vmatpush1.bf16.msra.mxu0 %v2301_v40  ;;  %1090 = vmatpush1.bf16.msra.mxu1 %v2303_v41 }
 0x39c   :  { %1050 = vmatprep.subr.bf16.mxu0 %v2305_v42  ;;  %1091 = vmatprep.subr.bf16.mxu1 %v2307_v43 }
 0x39f   :  { %1051 = vmatpush1.bf16.msra.mxu0 %v2317_v44  ;;  %1092 = vmatpush1.bf16.msra.mxu1 %v2319_v45 }
 0x3a0   :  { %1152 = vmatprep.subr.bf16.mxu0 %v2215_v11  ;;  %1193 = vmatprep.subr.bf16.mxu1 %v2217_v12 }
 0x455   :  { %v954_v49 = vpop.f32.mrb[28].mxu0  ;;  %v995_v7 = vpop.f32.mrb[28].mxu1 }
 0x456   :  { %v1002_v53 = vadd.f32 %v954_v49, %v2809_v54  ;;  %v1004_v57 = vadd.f32 %v995_v7, %v2810_v55  ;;  %v956_v56 = vpop.f32.mrb[29].mxu0  ;;  %v997_v1 = vpop.f32.mrb[29].mxu1 }
 0x457   :  { %v1003_v59 = vadd.f32 %v956_v56, %v2811_v58  ;;  %v1005_v3 = vadd.f32 %v997_v1, %v2812_v60  ;;  %v958_v48 = vpop.f32.mrb[30].mxu0  ;;  %v999_v63 = vpop.f32.mrb[30].mxu1 }
 0x458   :  { %v1695_v2 = vmul.f32 -1.442695, %v1002_v53  ;;  %v959_v4 = vpop.f32.mrb[31].mxu0  ;;  %v1000_v20 = vpop.f32.mrb[31].mxu1  ;;  %v1697_v12 = vmul.f32 -1.442695, %v1004_v57 }
 0x459   :  { %v1696_v11 = vmul.f32 -1.442695, %v1003_v59  ;;  %v2628_v48 = vld [vmem:[#allocation8 + $0x8] ss:$16 sps:$4 sm:$0xff]   ;;  %v2631_v63 = vld [vmem:[#allocation8 + $0x24] ss:$16 sps:$4 sm:$0xff]  }
 0x45a   :  { %1881 = vpow2.f32 %v1695_v2  ;;  %v2634_v2 = vld [vmem:[#allocation8 + $0x2c] ss:$16 sps:$4 sm:$0xff]   ;;  %v2639_v4 = vld [vmem:[#allocation8 + $0x20] ss:$16 sps:$4 sm:$0xff]   ;;  %v2642_v20 = vld [vmem:[#allocation8 + $0x28] ss:$16 sps:$4 sm:$0xff]  }
 0x45b   :  { %1883 = vpow2.f32 %v1696_v11  ;;  %v2645_v11 = vld [vmem:[#allocation8 + $0x44] ss:$16 sps:$4 sm:$0xff]  }
 0x45c   :  { %1885 = vtanh.f32 %v1005_v3  ;;  %v2625_v3 = vld [vmem:[#allocation8] ss:$16 sps:$4 sm:$0xff]  }
 0x45d   :  { %1887 = vpow2.f32 %v1697_v12  ;;  %v2648_v12 = vld [vmem:[#allocation8 + $0x4c] ss:$16 sps:$4 sm:$0xff]  }
 0x464   :  { %v1882_v8 = vpop.eup %1881 }
 0x465   :  { %v1015_v10 = vadd.f32 1.0, %v1882_v8  ;;  %v1884_v30 = vpop.eup %1883  ;;  %v2651_v8 = vld [vmem:[#allocation8 + $0x40] ss:$16 sps:$4 sm:$0xff]  }
 0x466   :  { %v1016_v5 = vadd.f32 1.0, %v1884_v30  ;;  %v1886_v0 = vpop.eup %1885  ;;  %v2657_v30 = vld [vmem:[#allocation8 + $0x64] ss:$16 sps:$4 sm:$0xff]  }
 0x467   :  { %1889 = vrcp.f32 %v1015_v10  ;;  %v1888_v50 = vpop.eup %1887  ;;  %v2654_v10 = vld [vmem:[#allocation8 + $0x48] ss:$16 sps:$4 sm:$0xff]  }
 0x468   :  { %1891 = vrcp.f32 %v1016_v5  ;;  %v1017_v47 = vadd.f32 1.0, %v1888_v50  ;;  %v2660_v5 = vld [vmem:[#allocation8 + $0x6c] ss:$16 sps:$4 sm:$0xff]   ;;  %v2666_v50 = vld [vmem:[#allocation8 + $0x68] ss:$16 sps:$4 sm:$0xff]  }
 0x46a   :  { %1893 = vrcp.f32 %v1017_v47  ;;  %v2678_v47 = vld [vmem:[#allocation8 + $0x88] ss:$16 sps:$4 sm:$0xff]  }
 0x471   :  { %v1890_v61 = vpop.eup %1889 }
 0x472   :  { %v1026_v9 = vmul.f32 %v1890_v61, %v1886_v0  ;;  %v1892_v52 = vpop.eup %1891  ;;  %v2663_v0 = vld [vmem:[#allocation8 + $0x60] ss:$16 sps:$4 sm:$0xff]   ;;  %v2669_v61 = vld [vmem:[#allocation8 + $0x84] ss:$16 sps:$4 sm:$0xff]  }
 0x473   :  { %v1025_v51 = vmul.f32 %v1892_v52, %v2534_v39  ;;  %v2675_v52 = vld [vmem:[#allocation8 + $0x80] ss:$16 sps:$4 sm:$0xff]  }
 0x474   :  { %v1894_v62 = vpop.eup %1893 }
 0x475   :  { %v2576_v46 = vadd.f32 %v1026_v9, %v1025_v51  ;;  %v2672_v9 = vld [vmem:[#allocation8 + $0x8c] ss:$16 sps:$4 sm:$0xff]   ;;  %v2681_v51 = vld [vmem:[#allocation8 + $0xa4] ss:$16 sps:$4 sm:$0xff]  }
 0x477   :  { %1895 = vtanh.f32 %v2576_v46 }
 0x481   :  { %v1896_v49 = vpop.eup %1895 }
 0x482   :  { %v1029_v7 = vmul.f32 %v1896_v49, %v1894_v62  ;;  %v2687_v62 = vld [vmem:[#allocation8 + $0xa0] ss:$16 sps:$4 sm:$0xff]   ;;  %v2690_v49 = vld [vmem:[#allocation8 + $0xa8] ss:$16 sps:$4 sm:$0xff]  }
 0x484   :  { %v1035_v54 = vpack.c.bf16 %v1029_v7, %v1029_v7  ;;  %v2693_v7 = vld [vmem:[#allocation8 + $0xc4] ss:$16 sps:$4 sm:$0xff]  }
 0x486   :  { %1069 = vmatmul.mubr.bf16.vlgmr.msra.gmra.mrb[32].mxu0 %v1035_v54  ;;  %1110 = vmatmul.mubr.bf16.vlgmr.msra.gmra.mrb[32].mxu1 %v1035_v54  ;;  %v2696_v54 = vld [vmem:[#allocation8 + $0xcc] ss:$16 sps:$4 sm:$0xff]  }
 0x487   :  { %1153 = vmatpush1.bf16.msra.mxu0 %v2219_v13  ;;  %1194 = vmatpush1.bf16.msra.mxu1 %v2221_v14  ;;  %v2611_v13 = vld [vmem:[#allocation8 + $0x4] ss:$16 sps:$4 sm:$0xff]   ;;  %v2614_v14 = vld [vmem:[#allocation8 + $0xc] ss:$16 sps:$4 sm:$0xff]  }
 0x488   :  { %1154 = vmatprep.subr.bf16.mxu0 %v2224_v15  ;;  %1195 = vmatprep.subr.bf16.mxu1 %v2227_v16 }
 0x489   :  { %1184 = vmatprep.mubr.bf16.mxu0 %v2807_v6  ;;  %1225 = vmatprep.mubr.bf16.mxu1 %v2807_v6 }
 0x48b   :  { %1155 = vmatpush1.bf16.msra.mxu0 %v2231_v17  ;;  %1196 = vmatpush1.bf16.msra.mxu1 %v2235_v18  ;;  %v2813_v17 = vld [vmem:[#allocation19_spill] sm:$0xff] }
 0x48c   :  { %1156 = vmatprep.subr.bf16.mxu0 %v2239_v19  ;;  %1197 = vmatprep.subr.bf16.mxu1 %v2243_v21  ;;  %v2814_v19 = vld [vmem:[#allocation20_spill] sm:$0xff] }
 0x48f   :  { %1157 = vmatpush1.bf16.msra.mxu0 %v2245_v22  ;;  %1198 = vmatpush1.bf16.msra.mxu1 %v2249_v23 }
 0x490   :  { %1158 = vmatprep.subr.bf16.mxu0 %v2253_v24  ;;  %1199 = vmatprep.subr.bf16.mxu1 %v2255_v25  ;;  %v2815_v24 = vld [vmem:[#allocation21_spill] sm:$0xff] }
 0x493   :  { %1159 = vmatpush1.bf16.msra.mxu0 %v2259_v26  ;;  %1200 = vmatpush1.bf16.msra.mxu1 %v2263_v27  ;;  %v2816_v26 = vld [vmem:[#allocation22_spill] sm:$0xff] }
 0x494   :  { %1160 = vmatprep.subr.bf16.mxu0 %v2267_v28  ;;  %1201 = vmatprep.subr.bf16.mxu1 %v2269_v29 }
 0x497   :  { %1161 = vmatpush1.bf16.msra.mxu0 %v2273_v31  ;;  %1202 = vmatpush1.bf16.msra.mxu1 %v2275_v32 }
 0x498   :  { %1162 = vmatprep.subr.bf16.mxu0 %v2279_v33  ;;  %1203 = vmatprep.subr.bf16.mxu1 %v2283_v34 }
 0x49b   :  { %1163 = vmatpush1.bf16.msra.mxu0 %v2287_v35  ;;  %1204 = vmatpush1.bf16.msra.mxu1 %v2289_v36 }
 0x49c   :  { %1164 = vmatprep.subr.bf16.mxu0 %v2293_v37  ;;  %1205 = vmatprep.subr.bf16.mxu1 %v2297_v38 }
 0x49f   :  { %1165 = vmatpush1.bf16.msra.mxu0 %v2301_v40  ;;  %1206 = vmatpush1.bf16.msra.mxu1 %v2303_v41 }
 0x4a0   :  { %1166 = vmatprep.subr.bf16.mxu0 %v2305_v42  ;;  %1207 = vmatprep.subr.bf16.mxu1 %v2307_v43 }
 0x4a3   :  { %1167 = vmatpush1.bf16.msra.mxu0 %v2317_v44  ;;  %1208 = vmatpush1.bf16.msra.mxu1 %v2319_v45 }
 0x4a4   :  { %1268 = vmatprep.subr.bf16.mxu0 %v2611_v13  ;;  %1309 = vmatprep.subr.bf16.mxu1 %v2614_v14 }
 0x559   :  { %v1070_v15 = vpop.f32.mrb[32].mxu0  ;;  %v1111_v16 = vpop.f32.mrb[32].mxu1 }
 0x55a   :  { %v1118_v18 = vadd.f32 %v1070_v15, %v2813_v17  ;;  %v1120_v21 = vadd.f32 %v1111_v16, %v2814_v19  ;;  %v1072_v22 = vpop.f32.mrb[33].mxu0  ;;  %v1113_v23 = vpop.f32.mrb[33].mxu1  ;;  %v2699_v15 = vld [vmem:[#allocation8 + $0xc0] ss:$16 sps:$4 sm:$0xff]   ;;  %v2702_v16 = vld [vmem:[#allocation8 + $0xc8] ss:$16 sps:$4 sm:$0xff]  }
 0x55b   :  { %v1119_v25 = vadd.f32 %v1072_v22, %v2815_v24  ;;  %v1121_v27 = vadd.f32 %v1113_v23, %v2816_v26  ;;  %v1074_v28 = vpop.f32.mrb[34].mxu0  ;;  %v1115_v29 = vpop.f32.mrb[34].mxu1  ;;  %v2705_v17 = vld [vmem:[#allocation8 + $0xe4] ss:$16 sps:$4 sm:$0xff]   ;;  %v2817_v22 = vld [vmem:[#allocation23_spill] sm:$0xff] }
 0x55c   :  { %v1698_v31 = vmul.f32 -1.442695, %v1118_v18  ;;  %v1075_v32 = vpop.f32.mrb[35].mxu0  ;;  %v1116_v33 = vpop.f32.mrb[35].mxu1  ;;  %v1700_v35 = vmul.f32 -1.442695, %v1120_v21 }
 0x55d   :  { %v1699_v34 = vmul.f32 -1.442695, %v1119_v25  ;;  %v2708_v18 = vld [vmem:[#allocation8 + $0xec] ss:$16 sps:$4 sm:$0xff]   ;;  %v2818_v24 = vld [vmem:[#allocation24_spill] sm:$0xff] }
 0x55e   :  { %1897 = vpow2.f32 %v1698_v31  ;;  %v2819_v28 = vld [vmem:[#allocation25_spill] sm:$0xff]  ;;  %v2820_v31 = vld [vmem:[#allocation26_spill] sm:$0xff] }
 0x55f   :  { %1899 = vpow2.f32 %v1699_v34 }
 0x560   :  { %1901 = vtanh.f32 %v1121_v27 }
 0x561   :  { %1903 = vpow2.f32 %v1700_v35 }
 0x568   :  { %v1898_v36 = vpop.eup %1897 }
 0x569   :  { %v1131_v37 = vadd.f32 1.0, %v1898_v36  ;;  %v1900_v38 = vpop.eup %1899 }
 0x56a   :  { %v1132_v40 = vadd.f32 1.0, %v1900_v38  ;;  %v1902_v41 = vpop.eup %1901 }
 0x56b   :  { %1905 = vrcp.f32 %v1131_v37  ;;  %v1904_v42 = vpop.eup %1903 }
 0x56c   :  { %1907 = vrcp.f32 %v1132_v40  ;;  %v1133_v55 = vadd.f32 1.0, %v1904_v42 }
 0x56e   :  { %1909 = vrcp.f32 %v1133_v55 }
 0x575   :  { %v1906_v43 = vpop.eup %1905 }
 0x576   :  { %v1142_v39 = vmul.f32 %v1906_v43, %v1902_v41  ;;  %v1908_v53 = vpop.eup %1907 }
 0x577   :  { %v1141_v57 = vmul.f32 %v1908_v53, %v2576_v46  ;;  %v2684_v46 = vld [vmem:[#allocation8 + $0xac] ss:$16 sps:$4 sm:$0xff]  }
 0x578   :  { %v1910_v1 = vpop.eup %1909 }
 0x579   :  { %v2622_v56 = vadd.f32 %v1142_v39, %v1141_v57 }
 0x57b   :  { %1911 = vtanh.f32 %v2622_v56 }
 0x585   :  { %v1912_v58 = vpop.eup %1911 }
 0x586   :  { %v1145_v59 = vmul.f32 %v1912_v58, %v1910_v1 }
 0x588   :  { %v1151_v60 = vpack.c.bf16 %v1145_v59, %v1145_v59 }
 0x58a   :  { %1185 = vmatmul.mubr.bf16.vlgmr.msra.gmra.mrb[36].mxu0 %v1151_v60  ;;  %1226 = vmatmul.mubr.bf16.vlgmr.msra.gmra.mrb[36].mxu1 %v1151_v60 }
 0x58b   :  { %1269 = vmatpush1.bf16.msra.mxu0 %v2625_v3  ;;  %1310 = vmatpush1.bf16.msra.mxu1 %v2628_v48 }
 0x58c   :  { %1270 = vmatprep.subr.bf16.mxu0 %v2631_v63  ;;  %1311 = vmatprep.subr.bf16.mxu1 %v2634_v2 }
 0x58d   :  { %1300 = vmatprep.mubr.bf16.mxu0 %v2807_v6  ;;  %1341 = vmatprep.mubr.bf16.mxu1 %v2807_v6 }
 0x58f   :  { %1271 = vmatpush1.bf16.msra.mxu0 %v2639_v4  ;;  %1312 = vmatpush1.bf16.msra.mxu1 %v2642_v20 }
 0x590   :  { %1272 = vmatprep.subr.bf16.mxu0 %v2645_v11  ;;  %1313 = vmatprep.subr.bf16.mxu1 %v2648_v12 }
 0x593   :  { %1273 = vmatpush1.bf16.msra.mxu0 %v2651_v8  ;;  %1314 = vmatpush1.bf16.msra.mxu1 %v2654_v10 }
 0x594   :  { %1274 = vmatprep.subr.bf16.mxu0 %v2657_v30  ;;  %1315 = vmatprep.subr.bf16.mxu1 %v2660_v5 }
 0x597   :  { %1275 = vmatpush1.bf16.msra.mxu0 %v2663_v0  ;;  %1316 = vmatpush1.bf16.msra.mxu1 %v2666_v50 }
 0x598   :  { %1276 = vmatprep.subr.bf16.mxu0 %v2669_v61  ;;  %1317 = vmatprep.subr.bf16.mxu1 %v2672_v9 }
 0x59b   :  { %1277 = vmatpush1.bf16.msra.mxu0 %v2675_v52  ;;  %1318 = vmatpush1.bf16.msra.mxu1 %v2678_v47 }
 0x59c   :  { %1278 = vmatprep.subr.bf16.mxu0 %v2681_v51  ;;  %1319 = vmatprep.subr.bf16.mxu1 %v2684_v46 }
 0x59f   :  { %1279 = vmatpush1.bf16.msra.mxu0 %v2687_v62  ;;  %1320 = vmatpush1.bf16.msra.mxu1 %v2690_v49 }
 0x5a0   :  { %1280 = vmatprep.subr.bf16.mxu0 %v2693_v7  ;;  %1321 = vmatprep.subr.bf16.mxu1 %v2696_v54 }
 0x5a3   :  { %1281 = vmatpush1.bf16.msra.mxu0 %v2699_v15  ;;  %1322 = vmatpush1.bf16.msra.mxu1 %v2702_v16 }
 0x5a4   :  { %1282 = vmatprep.subr.bf16.mxu0 %v2705_v17  ;;  %1323 = vmatprep.subr.bf16.mxu1 %v2708_v18 }
 0x5a7   :  { %1283 = vmatpush1.bf16.msra.mxu0 %v2317_v44  ;;  %1324 = vmatpush1.bf16.msra.mxu1 %v2319_v45 }
 0x5a8   :  { %1384 = vmatprep.subr.bf16.mxu0 %v2611_v13  ;;  %1425 = vmatprep.subr.bf16.mxu1 %v2614_v14 }
 0x65d   :  { %v1186_v19 = vpop.f32.mrb[36].mxu0  ;;  %v1227_v21 = vpop.f32.mrb[36].mxu1 }
 0x65e   :  { %v1234_v23 = vadd.f32 %v1186_v19, %v2817_v22  ;;  %v1236_v25 = vadd.f32 %v1227_v21, %v2818_v24  ;;  %v1188_v26 = vpop.f32.mrb[37].mxu0  ;;  %v1229_v27 = vpop.f32.mrb[37].mxu1 }
 0x65f   :  { %v1235_v29 = vadd.f32 %v1188_v26, %v2819_v28  ;;  %v1237_v32 = vadd.f32 %v1229_v27, %v2820_v31  ;;  %v1190_v33 = vpop.f32.mrb[38].mxu0  ;;  %v1231_v44 = vpop.f32.mrb[38].mxu1  ;;  %v1825_v28 = vld [vmem:[#allocation9] sm:$0xff]   ;;  %v1826_v31 = vld [vmem:[#allocation9 + $0x8] sm:$0xff]  }
 0x660   :  { %v1701_v34 = vmul.f32 -1.442695, %v1234_v23  ;;  %v1191_v45 = vpop.f32.mrb[39].mxu0  ;;  %v1232_v35 = vpop.f32.mrb[39].mxu1  ;;  %v1703_v14 = vmul.f32 -1.442695, %v1236_v25 }
 0x661   :  { %v1702_v13 = vmul.f32 -1.442695, %v1235_v29  ;;  %v2096_v29 = vmov 0.0   ;;  %v1828_v33 = vld [vmem:[#allocation9 + $0x18] sm:$0xff]   ;;  %v1829_v44 = vld [vmem:[#allocation9 + $0x20] sm:$0xff]   ;;  %v1831_v45 = vld [vmem:[#allocation9 + $0x30] sm:$0xff]  }
 0x662   :  { %1913 = vpow2.f32 %v1701_v34  ;;  %v1830_v34 = vld [vmem:[#allocation9 + $0x28] sm:$0xff]   ;;  %v1832_v35 = vld [vmem:[#allocation9 + $0x38] sm:$0xff]  }
 0x663   :  { %1915 = vpow2.f32 %v1702_v13 }
 0x664   :  { %1917 = vtanh.f32 %v1237_v32  ;;  %v1827_v32 = vld [vmem:[#allocation9 + $0x10] sm:$0xff]  }
 0x665   :  { %1919 = vpow2.f32 %v1703_v14 }
 0x66c   :  { %v1914_v36 = vpop.eup %1913 }
 0x66d   :  { %v1247_v37 = vadd.f32 1.0, %v1914_v36  ;;  %v1916_v38 = vpop.eup %1915  ;;  %v2825_v36 = vld [vmem:[#allocation31_spill] sm:$0xff] }
 0x66e   :  { %v1248_v40 = vadd.f32 1.0, %v1916_v38  ;;  %v1918_v41 = vpop.eup %1917  ;;  %v2826_v38 = vld [vmem:[#allocation32_spill] sm:$0xff] }
 0x66f   :  { %1921 = vrcp.f32 %v1247_v37  ;;  %v1920_v42 = vpop.eup %1919 }
 0x670   :  { %1923 = vrcp.f32 %v1248_v40  ;;  %v1249_v55 = vadd.f32 1.0, %v1920_v42 }
 0x672   :  { %1925 = vrcp.f32 %v1249_v55 }
 0x679   :  { %v1922_v43 = vpop.eup %1921 }
 0x67a   :  { %v1258_v39 = vmul.f32 %v1922_v43, %v1918_v41  ;;  %v1924_v53 = vpop.eup %1923  ;;  %v2827_v43 = vld [vmem:[#allocation33_spill] sm:$0xff] }
 0x67b   :  { %v1257_v57 = vmul.f32 %v1924_v53, %v2622_v56  ;;  %v1992_v56 = vld [vmem:[#allocation8 + $0xe8] ss:$16 sps:$4 sm:$0xff]   ;;  %v2828_v53 = vld [vmem:[#allocation34_spill] sm:$0xff] }
 0x67c   :  { %v1926_v58 = vpop.eup %1925 }
 0x67d   :  { %v2720_v1 = vadd.f32 %v1258_v39, %v1257_v57 }
 0x67f   :  { %1927 = vtanh.f32 %v2720_v1 }
 0x689   :  { %v1928_v59 = vpop.eup %1927 }
 0x68a   :  { %v1261_v60 = vmul.f32 %v1928_v59, %v1926_v58 }
 0x68c   :  { %v1267_v19 = vpack.c.bf16 %v1261_v60, %v1261_v60 }
 0x68e   :  { %1301 = vmatmul.mubr.bf16.vlgmr.msra.gmra.mrb[40].mxu0 %v1267_v19  ;;  %1342 = vmatmul.mubr.bf16.vlgmr.msra.gmra.mrb[40].mxu1 %v1267_v19 }
 0x68f   :  { %1385 = vmatpush1.bf16.msra.mxu0 %v2625_v3  ;;  %1426 = vmatpush1.bf16.msra.mxu1 %v2628_v48 }
 0x690   :  { %1386 = vmatprep.subr.bf16.mxu0 %v2631_v63  ;;  %1427 = vmatprep.subr.bf16.mxu1 %v2634_v2  ;;  %v2821_v63 = vld [vmem:[#allocation27_spill] sm:$0xff] }
 0x691   :  { %1416 = vmatprep.mubr.bf16.mxu0 %v2807_v6  ;;  %1457 = vmatprep.mubr.bf16.mxu1 %v2807_v6  ;;  %v1991_v6 = vld [vmem:[#allocation8 + $0xe0] ss:$16 sps:$4 sm:$0xff]  }
 0x693   :  { %1387 = vmatpush1.bf16.msra.mxu0 %v2639_v4  ;;  %1428 = vmatpush1.bf16.msra.mxu1 %v2642_v20  ;;  %v2822_v4 = vld [vmem:[#allocation28_spill] sm:$0xff] }
 0x694   :  { %1388 = vmatprep.subr.bf16.mxu0 %v2645_v11  ;;  %1429 = vmatprep.subr.bf16.mxu1 %v2648_v12 }
 0x697   :  { %1389 = vmatpush1.bf16.msra.mxu0 %v2651_v8  ;;  %1430 = vmatpush1.bf16.msra.mxu1 %v2654_v10  ;;  %v2823_v8 = vld [vmem:[#allocation29_spill] sm:$0xff] }
 0x698   :  { %1390 = vmatprep.subr.bf16.mxu0 %v2657_v30  ;;  %1431 = vmatprep.subr.bf16.mxu1 %v2660_v5  ;;  %v2824_v30 = vld [vmem:[#allocation30_spill] sm:$0xff] }
 0x69b   :  { %1391 = vmatpush1.bf16.msra.mxu0 %v2663_v0  ;;  %1432 = vmatpush1.bf16.msra.mxu1 %v2666_v50 }
 0x69c   :  { %1392 = vmatprep.subr.bf16.mxu0 %v2669_v61  ;;  %1433 = vmatprep.subr.bf16.mxu1 %v2672_v9 }
 0x69f   :  { %1393 = vmatpush1.bf16.msra.mxu0 %v2675_v52  ;;  %1434 = vmatpush1.bf16.msra.mxu1 %v2678_v47 }
 0x6a0   :  { %1394 = vmatprep.subr.bf16.mxu0 %v2681_v51  ;;  %1435 = vmatprep.subr.bf16.mxu1 %v2684_v46 }
 0x6a3   :  { %1395 = vmatpush1.bf16.msra.mxu0 %v2687_v62  ;;  %1436 = vmatpush1.bf16.msra.mxu1 %v2690_v49 }
 0x6a4   :  { %1396 = vmatprep.subr.bf16.mxu0 %v2693_v7  ;;  %1437 = vmatprep.subr.bf16.mxu1 %v2696_v54 }
 0x6a7   :  { %1397 = vmatpush1.bf16.msra.mxu0 %v2699_v15  ;;  %1438 = vmatpush1.bf16.msra.mxu1 %v2702_v16 }
 0x6a8   :  { %1398 = vmatprep.subr.bf16.mxu0 %v2705_v17  ;;  %1439 = vmatprep.subr.bf16.mxu1 %v2708_v18 }
 0x6ab   :  { %1399 = vmatpush1.bf16.msra.mxu0 %v1991_v6  ;;  %1440 = vmatpush1.bf16.msra.mxu1 %v1992_v56 }
 0x6ac   :  { %1730 = vmatprep.subr.bf16.mxu0 %v2096_v29 }
 0x761   :  { %v1302_v3 = vpop.f32.mrb[40].mxu0  ;;  %v1343_v48 = vpop.f32.mrb[40].mxu1 }
 0x762   :  { %v1350_v2 = vadd.f32 %v1302_v3, %v2821_v63  ;;  %v1352_v20 = vadd.f32 %v1343_v48, %v2822_v4  ;;  %v1304_v11 = vpop.f32.mrb[41].mxu0  ;;  %v1345_v12 = vpop.f32.mrb[41].mxu1 }
 0x763   :  { %v1351_v10 = vadd.f32 %v1304_v11, %v2823_v8  ;;  %v1353_v5 = vadd.f32 %v1345_v12, %v2824_v30  ;;  %v1306_v0 = vpop.f32.mrb[42].mxu0  ;;  %v1347_v50 = vpop.f32.mrb[42].mxu1 }
 0x764   :  { %v1704_v61 = vmul.f32 -1.442695, %v1350_v2  ;;  %v1307_v9 = vpop.f32.mrb[43].mxu0  ;;  %v1348_v52 = vpop.f32.mrb[43].mxu1  ;;  %v1706_v51 = vmul.f32 -1.442695, %v1352_v20 }
 0x765   :  { %v1705_v47 = vmul.f32 -1.442695, %v1351_v10  ;;  %v1710_v9 = vld [vmem:[%s2780_s5] ss:$0 sm:$0xff] }
 0x766   :  { %1929 = vpow2.f32 %v1704_v61 }
 0x767   :  { %1931 = vpow2.f32 %v1705_v47 }
 0x768   :  { %1933 = vtanh.f32 %v1353_v5 }
 0x769   :  { %1935 = vpow2.f32 %v1706_v51 }
 0x770   :  { %v1930_v46 = vpop.eup %1929 }
 0x771   :  { %v1363_v62 = vadd.f32 1.0, %v1930_v46  ;;  %v1932_v49 = vpop.eup %1931 }
 0x772   :  { %v1364_v7 = vadd.f32 1.0, %v1932_v49  ;;  %v1934_v54 = vpop.eup %1933 }
 0x773   :  { %1937 = vrcp.f32 %v1363_v62  ;;  %v1936_v15 = vpop.eup %1935  ;;  %v1719_v62 = vld [vmem:[%s2781_s6] ss:$0 sm:$0xff] }
 0x774   :  { %1939 = vrcp.f32 %v1364_v7  ;;  %v1365_v21 = vadd.f32 1.0, %v1936_v15  ;;  %v1720_v15 = vld [vmem:[#allocation3] ss:$0 sm:$0xff] }
 0x776   :  { %1941 = vrcp.f32 %v1365_v21 }
 0x77d   :  { %v1938_v16 = vpop.eup %1937 }
 0x77e   :  { %v1374_v17 = vmul.f32 %v1938_v16, %v1934_v54  ;;  %v1940_v18 = vpop.eup %1939 }
 0x77f   :  { %v1373_v22 = vmul.f32 %v1940_v18, %v2720_v1 }
 0x780   :  { %v1942_v24 = vpop.eup %1941 }
 0x781   :  { %v2758_v23 = vadd.f32 %v1374_v17, %v1373_v22 }
 0x783   :  { %1943 = vtanh.f32 %v2758_v23 }
 0x78d   :  { %v1944_v25 = vpop.eup %1943 }
 0x78e   :  { %v1377_v26 = vmul.f32 %v1944_v25, %v1942_v24 }
 0x790   :  { %v1383_v27 = vpack.c.bf16 %v1377_v26, %v1377_v26 }
 0x792   :  { %1417 = vmatmul.mubr.bf16.vlgmr.msra.gmra.mrb[44].mxu0 %v1383_v27  ;;  %1458 = vmatmul.mubr.bf16.vlgmr.msra.gmra.mrb[44].mxu1 %v1383_v27 }
 0x793   :  { %1731 = vmatpush3.bf16.msra.mxu0 %v1825_v28  ;;  %1746 = vmatprep.mubr.msk.bf16.mxu0 %vm2097_vm1, %v2096_v29 }
 0x794   :  { %1732 = vmatprep.subr.bf16.mxu0 %v2096_v29 }
 0x797   :  { %1733 = vmatpush3.bf16.msra.mxu0 %v1826_v31 }
 0x798   :  { %1734 = vmatprep.subr.bf16.mxu0 %v2096_v29 }
 0x79b   :  { %1735 = vmatpush3.bf16.msra.mxu0 %v1827_v32 }
 0x79c   :  { %1736 = vmatprep.subr.bf16.mxu0 %v2096_v29 }
 0x79f   :  { %1737 = vmatpush3.bf16.msra.mxu0 %v1828_v33 }
 0x7a0   :  { %1738 = vmatprep.subr.bf16.mxu0 %v2096_v29 }
 0x7a3   :  { %1739 = vmatpush3.bf16.msra.mxu0 %v1829_v44 }
 0x7a4   :  { %1740 = vmatprep.subr.bf16.mxu0 %v2096_v29 }
 0x7a7   :  { %1741 = vmatpush3.bf16.msra.mxu0 %v1830_v34 }
 0x7a8   :  { %1742 = vmatprep.subr.bf16.mxu0 %v2096_v29 }
 0x7ab   :  { %1743 = vmatpush3.bf16.msra.mxu0 %v1831_v45 }
 0x7ac   :  { %1744 = vmatprep.subr.bf16.mxu0 %v2096_v29 }
 0x7af   :  { %1745 = vmatpush3.bf16.msra.mxu0 %v1832_v35 }
 0x865   :  { %v1418_v13 = vpop.f32.mrb[44].mxu0  ;;  %v1459_v14 = vpop.f32.mrb[44].mxu1 }
 0x866   :  { %v1466_v37 = vadd.f32 %v1418_v13, %v2825_v36  ;;  %v1468_v40 = vadd.f32 %v1459_v14, %v2826_v38  ;;  %v1420_v41 = vpop.f32.mrb[45].mxu0  ;;  %v1461_v42 = vpop.f32.mrb[45].mxu1 }
 0x867   :  { %v1467_v39 = vadd.f32 %v1420_v41, %v2827_v43  ;;  %v1469_v55 = vadd.f32 %v1461_v42, %v2828_v53  ;;  %v1422_v57 = vpop.f32.mrb[46].mxu0  ;;  %v1463_v1 = vpop.f32.mrb[46].mxu1 }
 0x868   :  { %v1707_v58 = vmul.f32 -1.442695, %v1466_v37  ;;  %v1423_v59 = vpop.f32.mrb[47].mxu0  ;;  %v1464_v60 = vpop.f32.mrb[47].mxu1  ;;  %v1709_v6 = vmul.f32 -1.442695, %v1468_v40 }
 0x869   :  { %v1708_v19 = vmul.f32 -1.442695, %v1467_v39 }
 0x86a   :  { %1945 = vpow2.f32 %v1707_v58 }
 0x86b   :  { %1947 = vpow2.f32 %v1708_v19 }
 0x86c   :  { %1949 = vtanh.f32 %v1469_v55 }
 0x86d   :  { %1951 = vpow2.f32 %v1709_v6 }
 0x874   :  { %v1946_v56 = vpop.eup %1945 }
 0x875   :  { %v1479_v3 = vadd.f32 1.0, %v1946_v56  ;;  %v1948_v48 = vpop.eup %1947 }
 0x876   :  { %v1480_v63 = vadd.f32 1.0, %v1948_v48  ;;  %v1950_v2 = vpop.eup %1949 }
 0x877   :  { %1953 = vrcp.f32 %v1479_v3  ;;  %v1952_v4 = vpop.eup %1951 }
 0x878   :  { %1955 = vrcp.f32 %v1480_v63  ;;  %v1481_v8 = vadd.f32 1.0, %v1952_v4 }
 0x87a   :  { %1957 = vrcp.f32 %v1481_v8 }
 0x881   :  { %v1954_v20 = vpop.eup %1953 }
 0x882   :  { %v1490_v11 = vmul.f32 %v1954_v20, %v1950_v2  ;;  %v1956_v12 = vpop.eup %1955 }
 0x883   :  { %v1489_v10 = vmul.f32 %v1956_v12, %v2758_v23 }
 0x884   :  { %v1958_v5 = vpop.eup %1957 }
 0x885   :  { %v1491_v30 = vadd.f32 %v1490_v11, %v1489_v10 }
 0x887   :  { %1959 = vtanh.f32 %v1491_v30 }
 0x891   :  { %v1960_v0 = vpop.eup %1959 }
 0x892   :  { %v1493_v50 = vmul.f32 %v1960_v0, %v1958_v5 }
 0x894   :  { %v1494_v61 = vpack.c.bf16 %v1493_v50, %v1493_v50 }
 0x896   :  { %1747 = vmatmul.mubr.bf16.vlgmr.msra.gmra.mrb[48].mxu0 %v1494_v61 }
 0x969   :  { %v1600_v52 = vpop.f32.mrb[48].mxu0 }
 0x96a   :  { %v1601_v47 = vadd.f32 %v1710_v9, %v1600_v52  ;;  %v1748_v51 = vpop.f32.mrb[49].mxu0 }
 0x96b   :  { %v1603_v46 = vpop.f32.mrb[50].mxu0 }
 0x96c   :  { %v1606_v49 = vmax.f32 %v1601_v47, 0.0  ;;  %v1749_v7 = vpop.f32.mrb[51].mxu0 }
 0x96e   :  { %v1614_v54 = vmul.f32 %v1719_v62, %v1606_v49 }
 0x970   :  { %1615 = vadd.xlane.f32.xlu0 %v1614_v54 }
 0x9fd   :  { %v1616_v16 = vpop.xlane.xlu0 %1615 }
 0x9fe   :  { %v1624_v17 = vadd.f32 %v1720_v15, %v1616_v16 }
 0xa00   :  { %1626 = vst.msk [vmem:[%s2783_s8] sm:$0xff] %vm1625_vm2, %v1624_v17 }
 0xa01   :  { %1631 = vsyncpa [#allocation5], 1 }
 0xa02   :  { %1632 = vsyncpa [#allocation7], 1 }
 0xa03   :  { %1633 = vsyncpa [#allocation10], 1 }

</bundles_post_ra>
